<compile_context>
chip_gen: v6e
topology: v6e:2x2x1
jax: 0.10.0
libtpu: 0.0.40
codegen_flags: <defaults>
</compile_context>

<pallas_src>
import jax
import jax.numpy as jnp
from jax.experimental import pallas as pl
from jax.experimental.pallas import tpu as pltpu


_HP = 128          # lanes per gate group (one vreg lane width)
_NG = 4            # gates: i, f, o, g (reordered from PyTorch's i, f, g, o)
_KIN = 8           # padded contraction dim of the input projection (D + 1 -> 8)


def lstm_kernel(x_ref, wih_ref, whh_ref, wfc_ref, out_ref, xproj_ref):
    """Whole-sequence LSTM + final linear head in one kernel invocation.

    x_ref     : (T*B, _KIN)       time-major input, ones col at D, zero-padded
    wih_ref   : (_KIN, 4*_HP)     input->gates weight; row D holds b_ih + b_hh
    whh_ref   : (_HP, 4*_HP)      hidden->gates weight, rows >= H zero
    wfc_ref   : (2, _HP)          row 0 = fc weight (lanes >= H zero), [1,0] = fc bias
    out_ref   : (B, 1)            prediction from last timestep hidden state
    xproj_ref : (T*B, 4*_HP) VMEM scratch for the hoisted input projection
    """
    B = out_ref.shape[0]
    TB = x_ref.shape[0]
    T = TB // B

    # ---- hoisted input projection: one MXU matmul for the whole sequence.
    #      Bias is folded in via the ones column paired with wih row D.
    #      Staged in VMEM scratch so the unrolled loop doesn't spill vregs. ----
    xproj_ref[...] = jnp.dot(x_ref[...], wih_ref[...],
                             preferred_element_type=jnp.float32)   # (T*B, 512)

    # h0 = c0 = 0 (matches torch.zeros init); padded lanes [H, 128) stay 0.
    h = jnp.zeros((B, _HP), jnp.float32)
    c = jnp.zeros((B, _HP), jnp.float32)

    # ---- fully unrolled recurrence (T static). Only the h @ W_hh matmul and
    #      the lane-aligned gate math remain on the serial critical path.
    #      W_hh is loop-invariant; its MXU weight stream is hoisted by Mosaic. ----
    for t in range(T):
        gates = xproj_ref[t * B:(t + 1) * B, :] + jnp.dot(
            h, whh_ref[...], preferred_element_type=jnp.float32)   # (B, 512)
        # gate lane groups (after packing): i, f, o, g at 0/128/256/384
        sig = jax.nn.sigmoid(gates[:, :3 * _HP])   # one EUP launch: i, f, o
        g = jnp.tanh(gates[:, 3 * _HP:])           # one EUP launch: g
        i = sig[:, :_HP]
        f = sig[:, _HP:2 * _HP]
        o = sig[:, 2 * _HP:3 * _HP]
        c = f * c + i * g          # padded lanes: 0.5*0 + 0.5*0 = 0
        h = o * jnp.tanh(c)        # padded lanes: 0.5*tanh(0) = 0

    # ---- fc(out[:, -1, :]) as VPU mul + lane reduce (no 1-lane MXU pop);
    #      fc bias lives in wfc_ref[1, 0]. ----
    fc = jnp.sum(h * wfc_ref[0:1, :], axis=-1, keepdims=True)       # (B, 1)
    out_ref[...] = (fc + wfc_ref[1:2, 0:1]).astype(out_ref.dtype)


def _pack_gate_lanes(w, H):
    """w: (4H, K) in PyTorch gate order [i, f, g, o] -> (K, 4*_HP) with gate
    groups reordered to [i, f, o, g]; gate k occupies lanes [k*_HP, k*_HP + H),
    zero elsewhere."""
    i, f, g, o = jnp.split(w, 4, axis=0)
    cols = []
    for blk in (i, f, o, g):
        bt = blk.T                                       # (K, H)
        cols.append(jnp.pad(bt, ((0, 0), (0, _HP - H))))
    return jnp.concatenate(cols, axis=1)                 # (K, 4*_HP)


def pack_lstm_params(w_ih, w_hh, b_ih, b_hh, w_fc, b_fc):
    """One-time (model-load) packing of PyTorch LSTM/Linear params for the kernel."""
    H = w_hh.shape[1]
    D = w_ih.shape[1]
    assert D + 1 <= _KIN and H <= _HP

    wih_g = _pack_gate_lanes(w_ih.astype(jnp.float32), H)                  # (D, 512)
    bias_g = _pack_gate_lanes((b_ih + b_hh).astype(jnp.float32)[:, None], H)  # (1, 512)
    wih_aug = jnp.zeros((_KIN, _NG * _HP), jnp.float32)
    wih_aug = wih_aug.at[:D].set(wih_g).at[D].set(bias_g[0])               # (8, 512)

    whh_pad = jnp.zeros((_HP, _NG * _HP), jnp.float32)
    whh_pad = whh_pad.at[:H].set(_pack_gate_lanes(w_hh.astype(jnp.float32), H))  # (128, 512)

    wfc_pack = jnp.zeros((2, _HP), jnp.float32)
    wfc_pack = wfc_pack.at[0, :H].set(w_fc.reshape(H).astype(jnp.float32))
    wfc_pack = wfc_pack.at[1, 0].set(b_fc.reshape(()).astype(jnp.float32))  # (2, 128)

    return wih_aug, whh_pad, wfc_pack


def lstm_forward(x, wih_aug, whh_pad, wfc_pack):
    """x: (B, T, D) float32 (batch_first like PyTorch). Returns (B, 1) float32."""
    B, T, D = x.shape

    # Time-major, flattened, ones column for the folded bias, padded to _KIN.
    x_tm = jnp.transpose(x, (1, 0, 2)).reshape(T * B, D).astype(jnp.float32)
    x_aug = jnp.concatenate([x_tm, jnp.ones((T * B, 1), jnp.float32)], axis=1)
    x_aug = jnp.pad(x_aug, ((0, 0), (0, _KIN - (D + 1))))

    return pl.pallas_call(
        lstm_kernel,
        out_shape=jax.ShapeDtypeStruct((B, 1), jnp.float32),
        in_specs=[
            pl.BlockSpec(memory_space=pltpu.VMEM),   # x_aug    (T*B, 8)
            pl.BlockSpec(memory_space=pltpu.VMEM),   # wih_aug  (8, 512)
            pl.BlockSpec(memory_space=pltpu.VMEM),   # whh_pad  (128, 512)
            pl.BlockSpec(memory_space=pltpu.VMEM),   # wfc_pack (2, 128)
        ],
        out_specs=pl.BlockSpec(memory_space=pltpu.VMEM),
        scratch_shapes=[pltpu.VMEM((T * B, _NG * _HP), jnp.float32)],
    )(x_aug, wih_aug, whh_pad, wfc_pack)


def lstm_reference(x, w_ih, w_hh, b_ih, b_hh, w_fc, b_fc):
    """Pure-JAX reference mirroring torch.nn.LSTM(batch_first=True) + Linear."""
    B, T, D = x.shape
    H = w_hh.shape[1]
    h = jnp.zeros((B, H), jnp.float32)
    c = jnp.zeros((B, H), jnp.float32)

    def step(carry, xt):
        h, c = carry
        gates = xt @ w_ih.T + b_ih + h @ w_hh.T + b_hh
        i = jax.nn.sigmoid(gates[:, 0 * H:1 * H])
        f = jax.nn.sigmoid(gates[:, 1 * H:2 * H])
        g = jnp.tanh(gates[:, 2 * H:3 * H])
        o = jax.nn.sigmoid(gates[:, 3 * H:4 * H])
        c = f * c + i * g
        h = o * jnp.tanh(c)
        return (h, c), None

    (h, c), _ = jax.lax.scan(step, (h, c), jnp.transpose(x, (1, 0, 2)))
    return h @ w_fc.T + b_fc


if __name__ == "__main__":
    # Module config: input_size=4 features, hidden_size=40, num_stacked_layers=1
    B, T, D, H = 8, 8, 4, 40

    key = jax.random.PRNGKey(0)
    ks = jax.random.split(key, 7)
    bound = 1.0 / jnp.sqrt(H)   # PyTorch default uniform init bound

    x = jax.random.normal(ks[0], (B, T, D), jnp.float32)
    w_ih = jax.random.uniform(ks[1], (4 * H, D), jnp.float32, -bound, bound)
    w_hh = jax.random.uniform(ks[2], (4 * H, H), jnp.float32, -bound, bound)
    b_ih = jax.random.uniform(ks[3], (4 * H,), jnp.float32, -bound, bound)
    b_hh = jax.random.uniform(ks[4], (4 * H,), jnp.float32, -bound, bound)
    w_fc = jax.random.uniform(ks[5], (1, H), jnp.float32, -bound, bound)
    b_fc = jax.random.uniform(ks[6], (1,), jnp.float32, -bound, bound)

    # One-time weight packing (model-load time, off the hot path).
    wih_aug, whh_pad, wfc_pack = pack_lstm_params(w_ih, w_hh, b_ih, b_hh, w_fc, b_fc)

    out = lstm_forward(x, wih_aug, whh_pad, wfc_pack)
    out = jax.block_until_ready(out)

    ref = lstm_reference(x, w_ih, w_hh, b_ih, b_hh, w_fc, b_fc)
    assert out.shape == (B, 1), out.shape
    assert jnp.max(jnp.abs(out - ref)) < 1e-4, "mismatch vs reference"

    print("KERNEL_OK")
</pallas_src>

<mosaic_0001>
module attributes {stable_mosaic.version = 11 : i64} {
  func.func @lstm_kernel(%arg0: memref<64x8xf32, #tpu.memory_space<vmem>>, %arg1: memref<8x512xf32, #tpu.memory_space<vmem>>, %arg2: memref<128x512xf32, #tpu.memory_space<vmem>>, %arg3: memref<2x128xf32, #tpu.memory_space<vmem>>, %arg4: memref<8x1xf32, #tpu.memory_space<vmem>>, %arg5: memref<64x512xf32, #tpu.memory_space<vmem>>) attributes {dimension_semantics = [], scalar_prefetch = 0 : i64, scratch_operands = 1 : i64, tpu.core_type = #tpu.core_type<tc>} {
    %c0 = arith.constant 0 : index
    %c0_0 = arith.constant 0 : index
    %0 = vector.load %arg0[%c0, %c0_0] : memref<64x8xf32, #tpu.memory_space<vmem>>, vector<64x8xf32>
    %c0_1 = arith.constant 0 : index
    %c0_2 = arith.constant 0 : index
    %1 = vector.load %arg1[%c0_1, %c0_2] : memref<8x512xf32, #tpu.memory_space<vmem>>, vector<8x512xf32>
    %cst = arith.constant dense<0.000000e+00> : vector<64x512xf32>
    %2 = tpu.matmul %0, %1, %cst {dimension_numbers = #tpu.dot_dimension_numbers<[1], [0], [0], [1], [0, 0, 1, 1], [], []>} : vector<64x8xf32>, vector<8x512xf32>, vector<64x512xf32> -> vector<64x512xf32>
    %c0_3 = arith.constant 0 : index
    %c0_4 = arith.constant 0 : index
    %3 = vector.load %arg5[%c0_3, %c0_4] : memref<64x512xf32, #tpu.memory_space<vmem>>, vector<64x512xf32>
    tpu.vector_store %arg5[%c0_3, %c0_4], %2 {strides = array<i32>} : memref<64x512xf32, #tpu.memory_space<vmem>>, vector<64x512xf32>,
    %cst_5 = arith.constant 0.000000e+00 : f32
    %4 = vector.broadcast %cst_5 : f32 to vector<8x128xf32>
    %cst_6 = arith.constant 0.000000e+00 : f32
    %5 = vector.broadcast %cst_6 : f32 to vector<8x128xf32>
    %c0_7 = arith.constant 0 : index
    %c0_8 = arith.constant 0 : index
    %6 = vector.load %arg5[%c0_7, %c0_8] : memref<64x512xf32, #tpu.memory_space<vmem>>, vector<8x512xf32>
    %c0_9 = arith.constant 0 : index
    %c0_10 = arith.constant 0 : index
    %7 = vector.load %arg2[%c0_9, %c0_10] : memref<128x512xf32, #tpu.memory_space<vmem>>, vector<128x512xf32>
    %cst_11 = arith.constant dense<0.000000e+00> : vector<8x512xf32>
    %8 = tpu.matmul %4, %7, %cst_11 {dimension_numbers = #tpu.dot_dimension_numbers<[1], [0], [0], [1], [0, 0, 1, 1], [], []>} : vector<8x128xf32>, vector<128x512xf32>, vector<8x512xf32> -> vector<8x512xf32>
    %9 = arith.addf %6, %8 : vector<8x512xf32>
    %10 = vector.extract_strided_slice %9 {offsets = [0, 0], sizes = [8, 384], strides = [1, 1]} : vector<8x512xf32> to vector<8x384xf32>
    %11 = arith.negf %10 : vector<8x384xf32>
    %12 = math.exp %11 : vector<8x384xf32>
    %cst_12 = arith.constant 1.000000e+00 : f32
    %13 = vector.broadcast %cst_12 : f32 to vector<8x384xf32>
    %14 = arith.addf %13, %12 : vector<8x384xf32>
    %15 = arith.divf %13, %14 : vector<8x384xf32>
    %16 = vector.extract_strided_slice %9 {offsets = [0, 384], sizes = [8, 128], strides = [1, 1]} : vector<8x512xf32> to vector<8x128xf32>
    %17 = math.tanh %16 : vector<8x128xf32>
    %18 = vector.extract_strided_slice %15 {offsets = [0, 0], sizes = [8, 128], strides = [1, 1]} : vector<8x384xf32> to vector<8x128xf32>
    %19 = vector.extract_strided_slice %15 {offsets = [0, 128], sizes = [8, 128], strides = [1, 1]} : vector<8x384xf32> to vector<8x128xf32>
    %20 = vector.extract_strided_slice %15 {offsets = [0, 256], sizes = [8, 128], strides = [1, 1]} : vector<8x384xf32> to vector<8x128xf32>
    %21 = arith.mulf %19, %5 : vector<8x128xf32>
    %22 = arith.mulf %18, %17 : vector<8x128xf32>
    %23 = arith.addf %21, %22 : vector<8x128xf32>
    %24 = math.tanh %23 : vector<8x128xf32>
    %25 = arith.mulf %20, %24 : vector<8x128xf32>
    %c8 = arith.constant 8 : index
    %c0_13 = arith.constant 0 : index
    %26 = vector.load %arg5[%c8, %c0_13] : memref<64x512xf32, #tpu.memory_space<vmem>>, vector<8x512xf32>
    %c0_14 = arith.constant 0 : index
    %c0_15 = arith.constant 0 : index
    %27 = vector.load %arg2[%c0_14, %c0_15] : memref<128x512xf32, #tpu.memory_space<vmem>>, vector<128x512xf32>
    %cst_16 = arith.constant dense<0.000000e+00> : vector<8x512xf32>
    %28 = tpu.matmul %25, %27, %cst_16 {dimension_numbers = #tpu.dot_dimension_numbers<[1], [0], [0], [1], [0, 0, 1, 1], [], []>} : vector<8x128xf32>, vector<128x512xf32>, vector<8x512xf32> -> vector<8x512xf32>
    %29 = arith.addf %26, %28 : vector<8x512xf32>
    %30 = vector.extract_strided_slice %29 {offsets = [0, 0], sizes = [8, 384], strides = [1, 1]} : vector<8x512xf32> to vector<8x384xf32>
    %31 = arith.negf %30 : vector<8x384xf32>
    %32 = math.exp %31 : vector<8x384xf32>
    %cst_17 = arith.constant 1.000000e+00 : f32
    %33 = vector.broadcast %cst_17 : f32 to vector<8x384xf32>
    %34 = arith.addf %33, %32 : vector<8x384xf32>
    %35 = arith.divf %33, %34 : vector<8x384xf32>
    %36 = vector.extract_strided_slice %29 {offsets = [0, 384], sizes = [8, 128], strides = [1, 1]} : vector<8x512xf32> to vector<8x128xf32>
    %37 = math.tanh %36 : vector<8x128xf32>
    %38 = vector.extract_strided_slice %35 {offsets = [0, 0], sizes = [8, 128], strides = [1, 1]} : vector<8x384xf32> to vector<8x128xf32>
    %39 = vector.extract_strided_slice %35 {offsets = [0, 128], sizes = [8, 128], strides = [1, 1]} : vector<8x384xf32> to vector<8x128xf32>
    %40 = vector.extract_strided_slice %35 {offsets = [0, 256], sizes = [8, 128], strides = [1, 1]} : vector<8x384xf32> to vector<8x128xf32>
    %41 = arith.mulf %39, %23 : vector<8x128xf32>
    %42 = arith.mulf %38, %37 : vector<8x128xf32>
    %43 = arith.addf %41, %42 : vector<8x128xf32>
    %44 = math.tanh %43 : vector<8x128xf32>
    %45 = arith.mulf %40, %44 : vector<8x128xf32>
    %c16 = arith.constant 16 : index
    %c0_18 = arith.constant 0 : index
    %46 = vector.load %arg5[%c16, %c0_18] : memref<64x512xf32, #tpu.memory_space<vmem>>, vector<8x512xf32>
    %c0_19 = arith.constant 0 : index
    %c0_20 = arith.constant 0 : index
    %47 = vector.load %arg2[%c0_19, %c0_20] : memref<128x512xf32, #tpu.memory_space<vmem>>, vector<128x512xf32>
    %cst_21 = arith.constant dense<0.000000e+00> : vector<8x512xf32>
    %48 = tpu.matmul %45, %47, %cst_21 {dimension_numbers = #tpu.dot_dimension_numbers<[1], [0], [0], [1], [0, 0, 1, 1], [], []>} : vector<8x128xf32>, vector<128x512xf32>, vector<8x512xf32> -> vector<8x512xf32>
    %49 = arith.addf %46, %48 : vector<8x512xf32>
    %50 = vector.extract_strided_slice %49 {offsets = [0, 0], sizes = [8, 384], strides = [1, 1]} : vector<8x512xf32> to vector<8x384xf32>
    %51 = arith.negf %50 : vector<8x384xf32>
    %52 = math.exp %51 : vector<8x384xf32>
    %cst_22 = arith.constant 1.000000e+00 : f32
    %53 = vector.broadcast %cst_22 : f32 to vector<8x384xf32>
    %54 = arith.addf %53, %52 : vector<8x384xf32>
    %55 = arith.divf %53, %54 : vector<8x384xf32>
    %56 = vector.extract_strided_slice %49 {offsets = [0, 384], sizes = [8, 128], strides = [1, 1]} : vector<8x512xf32> to vector<8x128xf32>
    %57 = math.tanh %56 : vector<8x128xf32>
    %58 = vector.extract_strided_slice %55 {offsets = [0, 0], sizes = [8, 128], strides = [1, 1]} : vector<8x384xf32> to vector<8x128xf32>
    %59 = vector.extract_strided_slice %55 {offsets = [0, 128], sizes = [8, 128], strides = [1, 1]} : vector<8x384xf32> to vector<8x128xf32>
    %60 = vector.extract_strided_slice %55 {offsets = [0, 256], sizes = [8, 128], strides = [1, 1]} : vector<8x384xf32> to vector<8x128xf32>
    %61 = arith.mulf %59, %43 : vector<8x128xf32>
    %62 = arith.mulf %58, %57 : vector<8x128xf32>
    %63 = arith.addf %61, %62 : vector<8x128xf32>
    %64 = math.tanh %63 : vector<8x128xf32>
    %65 = arith.mulf %60, %64 : vector<8x128xf32>
    %c24 = arith.constant 24 : index
    %c0_23 = arith.constant 0 : index
    %66 = vector.load %arg5[%c24, %c0_23] : memref<64x512xf32, #tpu.memory_space<vmem>>, vector<8x512xf32>
    %c0_24 = arith.constant 0 : index
    %c0_25 = arith.constant 0 : index
    %67 = vector.load %arg2[%c0_24, %c0_25] : memref<128x512xf32, #tpu.memory_space<vmem>>, vector<128x512xf32>
    %cst_26 = arith.constant dense<0.000000e+00> : vector<8x512xf32>
    %68 = tpu.matmul %65, %67, %cst_26 {dimension_numbers = #tpu.dot_dimension_numbers<[1], [0], [0], [1], [0, 0, 1, 1], [], []>} : vector<8x128xf32>, vector<128x512xf32>, vector<8x512xf32> -> vector<8x512xf32>
    %69 = arith.addf %66, %68 : vector<8x512xf32>
    %70 = vector.extract_strided_slice %69 {offsets = [0, 0], sizes = [8, 384], strides = [1, 1]} : vector<8x512xf32> to vector<8x384xf32>
    %71 = arith.negf %70 : vector<8x384xf32>
    %72 = math.exp %71 : vector<8x384xf32>
    %cst_27 = arith.constant 1.000000e+00 : f32
    %73 = vector.broadcast %cst_27 : f32 to vector<8x384xf32>
    %74 = arith.addf %73, %72 : vector<8x384xf32>
    %75 = arith.divf %73, %74 : vector<8x384xf32>
    %76 = vector.extract_strided_slice %69 {offsets = [0, 384], sizes = [8, 128], strides = [1, 1]} : vector<8x512xf32> to vector<8x128xf32>
    %77 = math.tanh %76 : vector<8x128xf32>
    %78 = vector.extract_strided_slice %75 {offsets = [0, 0], sizes = [8, 128], strides = [1, 1]} : vector<8x384xf32> to vector<8x128xf32>
    %79 = vector.extract_strided_slice %75 {offsets = [0, 128], sizes = [8, 128], strides = [1, 1]} : vector<8x384xf32> to vector<8x128xf32>
    %80 = vector.extract_strided_slice %75 {offsets = [0, 256], sizes = [8, 128], strides = [1, 1]} : vector<8x384xf32> to vector<8x128xf32>
    %81 = arith.mulf %79, %63 : vector<8x128xf32>
    %82 = arith.mulf %78, %77 : vector<8x128xf32>
    %83 = arith.addf %81, %82 : vector<8x128xf32>
    %84 = math.tanh %83 : vector<8x128xf32>
    %85 = arith.mulf %80, %84 : vector<8x128xf32>
    %c32 = arith.constant 32 : index
    %c0_28 = arith.constant 0 : index
    %86 = vector.load %arg5[%c32, %c0_28] : memref<64x512xf32, #tpu.memory_space<vmem>>, vector<8x512xf32>
    %c0_29 = arith.constant 0 : index
    %c0_30 = arith.constant 0 : index
    %87 = vector.load %arg2[%c0_29, %c0_30] : memref<128x512xf32, #tpu.memory_space<vmem>>, vector<128x512xf32>
    %cst_31 = arith.constant dense<0.000000e+00> : vector<8x512xf32>
    %88 = tpu.matmul %85, %87, %cst_31 {dimension_numbers = #tpu.dot_dimension_numbers<[1], [0], [0], [1], [0, 0, 1, 1], [], []>} : vector<8x128xf32>, vector<128x512xf32>, vector<8x512xf32> -> vector<8x512xf32>
    %89 = arith.addf %86, %88 : vector<8x512xf32>
    %90 = vector.extract_strided_slice %89 {offsets = [0, 0], sizes = [8, 384], strides = [1, 1]} : vector<8x512xf32> to vector<8x384xf32>
    %91 = arith.negf %90 : vector<8x384xf32>
    %92 = math.exp %91 : vector<8x384xf32>
    %cst_32 = arith.constant 1.000000e+00 : f32
    %93 = vector.broadcast %cst_32 : f32 to vector<8x384xf32>
    %94 = arith.addf %93, %92 : vector<8x384xf32>
    %95 = arith.divf %93, %94 : vector<8x384xf32>
    %96 = vector.extract_strided_slice %89 {offsets = [0, 384], sizes = [8, 128], strides = [1, 1]} : vector<8x512xf32> to vector<8x128xf32>
    %97 = math.tanh %96 : vector<8x128xf32>
    %98 = vector.extract_strided_slice %95 {offsets = [0, 0], sizes = [8, 128], strides = [1, 1]} : vector<8x384xf32> to vector<8x128xf32>
    %99 = vector.extract_strided_slice %95 {offsets = [0, 128], sizes = [8, 128], strides = [1, 1]} : vector<8x384xf32> to vector<8x128xf32>
    %100 = vector.extract_strided_slice %95 {offsets = [0, 256], sizes = [8, 128], strides = [1, 1]} : vector<8x384xf32> to vector<8x128xf32>
    %101 = arith.mulf %99, %83 : vector<8x128xf32>
    %102 = arith.mulf %98, %97 : vector<8x128xf32>
    %103 = arith.addf %101, %102 : vector<8x128xf32>
    %104 = math.tanh %103 : vector<8x128xf32>
    %105 = arith.mulf %100, %104 : vector<8x128xf32>
    %c40 = arith.constant 40 : index
    %c0_33 = arith.constant 0 : index
    %106 = vector.load %arg5[%c40, %c0_33] : memref<64x512xf32, #tpu.memory_space<vmem>>, vector<8x512xf32>
    %c0_34 = arith.constant 0 : index
    %c0_35 = arith.constant 0 : index
    %107 = vector.load %arg2[%c0_34, %c0_35] : memref<128x512xf32, #tpu.memory_space<vmem>>, vector<128x512xf32>
    %cst_36 = arith.constant dense<0.000000e+00> : vector<8x512xf32>
    %108 = tpu.matmul %105, %107, %cst_36 {dimension_numbers = #tpu.dot_dimension_numbers<[1], [0], [0], [1], [0, 0, 1, 1], [], []>} : vector<8x128xf32>, vector<128x512xf32>, vector<8x512xf32> -> vector<8x512xf32>
    %109 = arith.addf %106, %108 : vector<8x512xf32>
    %110 = vector.extract_strided_slice %109 {offsets = [0, 0], sizes = [8, 384], strides = [1, 1]} : vector<8x512xf32> to vector<8x384xf32>
    %111 = arith.negf %110 : vector<8x384xf32>
    %112 = math.exp %111 : vector<8x384xf32>
    %cst_37 = arith.constant 1.000000e+00 : f32
    %113 = vector.broadcast %cst_37 : f32 to vector<8x384xf32>
    %114 = arith.addf %113, %112 : vector<8x384xf32>
    %115 = arith.divf %113, %114 : vector<8x384xf32>
    %116 = vector.extract_strided_slice %109 {offsets = [0, 384], sizes = [8, 128], strides = [1, 1]} : vector<8x512xf32> to vector<8x128xf32>
    %117 = math.tanh %116 : vector<8x128xf32>
    %118 = vector.extract_strided_slice %115 {offsets = [0, 0], sizes = [8, 128], strides = [1, 1]} : vector<8x384xf32> to vector<8x128xf32>
    %119 = vector.extract_strided_slice %115 {offsets = [0, 128], sizes = [8, 128], strides = [1, 1]} : vector<8x384xf32> to vector<8x128xf32>
    %120 = vector.extract_strided_slice %115 {offsets = [0, 256], sizes = [8, 128], strides = [1, 1]} : vector<8x384xf32> to vector<8x128xf32>
    %121 = arith.mulf %119, %103 : vector<8x128xf32>
    %122 = arith.mulf %118, %117 : vector<8x128xf32>
    %123 = arith.addf %121, %122 : vector<8x128xf32>
    %124 = math.tanh %123 : vector<8x128xf32>
    %125 = arith.mulf %120, %124 : vector<8x128xf32>
    %c48 = arith.constant 48 : index
    %c0_38 = arith.constant 0 : index
    %126 = vector.load %arg5[%c48, %c0_38] : memref<64x512xf32, #tpu.memory_space<vmem>>, vector<8x512xf32>
    %c0_39 = arith.constant 0 : index
    %c0_40 = arith.constant 0 : index
    %127 = vector.load %arg2[%c0_39, %c0_40] : memref<128x512xf32, #tpu.memory_space<vmem>>, vector<128x512xf32>
    %cst_41 = arith.constant dense<0.000000e+00> : vector<8x512xf32>
    %128 = tpu.matmul %125, %127, %cst_41 {dimension_numbers = #tpu.dot_dimension_numbers<[1], [0], [0], [1], [0, 0, 1, 1], [], []>} : vector<8x128xf32>, vector<128x512xf32>, vector<8x512xf32> -> vector<8x512xf32>
    %129 = arith.addf %126, %128 : vector<8x512xf32>
    %130 = vector.extract_strided_slice %129 {offsets = [0, 0], sizes = [8, 384], strides = [1, 1]} : vector<8x512xf32> to vector<8x384xf32>
    %131 = arith.negf %130 : vector<8x384xf32>
    %132 = math.exp %131 : vector<8x384xf32>
    %cst_42 = arith.constant 1.000000e+00 : f32
    %133 = vector.broadcast %cst_42 : f32 to vector<8x384xf32>
    %134 = arith.addf %133, %132 : vector<8x384xf32>
    %135 = arith.divf %133, %134 : vector<8x384xf32>
    %136 = vector.extract_strided_slice %129 {offsets = [0, 384], sizes = [8, 128], strides = [1, 1]} : vector<8x512xf32> to vector<8x128xf32>
    %137 = math.tanh %136 : vector<8x128xf32>
    %138 = vector.extract_strided_slice %135 {offsets = [0, 0], sizes = [8, 128], strides = [1, 1]} : vector<8x384xf32> to vector<8x128xf32>
    %139 = vector.extract_strided_slice %135 {offsets = [0, 128], sizes = [8, 128], strides = [1, 1]} : vector<8x384xf32> to vector<8x128xf32>
    %140 = vector.extract_strided_slice %135 {offsets = [0, 256], sizes = [8, 128], strides = [1, 1]} : vector<8x384xf32> to vector<8x128xf32>
    %141 = arith.mulf %139, %123 : vector<8x128xf32>
    %142 = arith.mulf %138, %137 : vector<8x128xf32>
    %143 = arith.addf %141, %142 : vector<8x128xf32>
    %144 = math.tanh %143 : vector<8x128xf32>
    %145 = arith.mulf %140, %144 : vector<8x128xf32>
    %c56 = arith.constant 56 : index
    %c0_43 = arith.constant 0 : index
    %146 = vector.load %arg5[%c56, %c0_43] : memref<64x512xf32, #tpu.memory_space<vmem>>, vector<8x512xf32>
    %c0_44 = arith.constant 0 : index
    %c0_45 = arith.constant 0 : index
    %147 = vector.load %arg2[%c0_44, %c0_45] : memref<128x512xf32, #tpu.memory_space<vmem>>, vector<128x512xf32>
    %cst_46 = arith.constant dense<0.000000e+00> : vector<8x512xf32>
    %148 = tpu.matmul %145, %147, %cst_46 {dimension_numbers = #tpu.dot_dimension_numbers<[1], [0], [0], [1], [0, 0, 1, 1], [], []>} : vector<8x128xf32>, vector<128x512xf32>, vector<8x512xf32> -> vector<8x512xf32>
    %149 = arith.addf %146, %148 : vector<8x512xf32>
    %150 = vector.extract_strided_slice %149 {offsets = [0, 0], sizes = [8, 384], strides = [1, 1]} : vector<8x512xf32> to vector<8x384xf32>
    %151 = arith.negf %150 : vector<8x384xf32>
    %152 = math.exp %151 : vector<8x384xf32>
    %cst_47 = arith.constant 1.000000e+00 : f32
    %153 = vector.broadcast %cst_47 : f32 to vector<8x384xf32>
    %154 = arith.addf %153, %152 : vector<8x384xf32>
    %155 = arith.divf %153, %154 : vector<8x384xf32>
    %156 = vector.extract_strided_slice %149 {offsets = [0, 384], sizes = [8, 128], strides = [1, 1]} : vector<8x512xf32> to vector<8x128xf32>
    %157 = math.tanh %156 : vector<8x128xf32>
    %158 = vector.extract_strided_slice %155 {offsets = [0, 0], sizes = [8, 128], strides = [1, 1]} : vector<8x384xf32> to vector<8x128xf32>
    %159 = vector.extract_strided_slice %155 {offsets = [0, 128], sizes = [8, 128], strides = [1, 1]} : vector<8x384xf32> to vector<8x128xf32>
    %160 = vector.extract_strided_slice %155 {offsets = [0, 256], sizes = [8, 128], strides = [1, 1]} : vector<8x384xf32> to vector<8x128xf32>
    %161 = arith.mulf %159, %143 : vector<8x128xf32>
    %162 = arith.mulf %158, %157 : vector<8x128xf32>
    %163 = arith.addf %161, %162 : vector<8x128xf32>
    %164 = math.tanh %163 : vector<8x128xf32>
    %165 = arith.mulf %160, %164 : vector<8x128xf32>
    %c0_48 = arith.constant 0 : index
    %c0_49 = arith.constant 0 : index
    %166 = vector.load %arg3[%c0_48, %c0_49] : memref<2x128xf32, #tpu.memory_space<vmem>>, vector<1x128xf32>
    %167 = vector.broadcast %166 : vector<1x128xf32> to vector<8x128xf32>
    %168 = arith.mulf %165, %167 : vector<8x128xf32>
    %cst_50 = arith.constant dense<0.000000e+00> : vector<8xf32>
    %169 = vector.multi_reduction <add>, %168, %cst_50 [1] : vector<8x128xf32> to vector<8xf32>
    %170 = vector.shape_cast %169 : vector<8xf32> to vector<8x1xf32>
    %c1 = arith.constant 1 : index
    %c0_51 = arith.constant 0 : index
    %171 = vector.load %arg3[%c1, %c0_51] : memref<2x128xf32, #tpu.memory_space<vmem>>, vector<1x1xf32>
    %172 = vector.broadcast %171 : vector<1x1xf32> to vector<8x1xf32>
    %173 = arith.addf %170, %172 : vector<8x1xf32>
    %c0_52 = arith.constant 0 : index
    %c0_53 = arith.constant 0 : index
    %174 = vector.load %arg4[%c0_52, %c0_53] : memref<8x1xf32, #tpu.memory_space<vmem>>, vector<8x1xf32>
    tpu.vector_store %arg4[%c0_52, %c0_53], %173 {strides = array<i32>} : memref<8x1xf32, #tpu.memory_space<vmem>>, vector<8x1xf32>,
    return
  }
}

</mosaic_0001>

<bundles_post_ra>
// kernel: tpu_custom_call.1
= control target key start
LH: loop header
LB: loop body
LE: loop exit
PB: predicated region body
PF: predicated region fallthrough
CT: control target
= control target key end

     0   :  { %9 = vsyncpa [#allocation4], 0  ;;  %s2063_s15 = smov [#allocation3]   ;;  %s3066_s0 = inlined_call_operand.vmem [shape: f32[64,8], index: 0, kind: input, shape index: {}]   ;;  %s3067_s1 = inlined_call_operand.vmem [shape: f32[8,512], index: 1, kind: input, shape index: {}]   ;;  %s3068_s2 = inlined_call_operand.hbm [shape: f32[128,512], index: 2, kind: input, shape index: {}]   ;;  %s3069_s3 = inlined_call_operand.vmem [shape: f32[2,128], index: 3, kind: input, shape index: {}]   ;;  %s3070_s4 = inlined_call_operand.vmem [shape: f32[8,1], index: 4, kind: output, shape index: {}]  }
   0x1   :  { %s19_s16 = sshll.u32 %s2063_s15, 4  ;;  %s20_s16 = int_to_ptr.vmem [resolvable:$true] %s19_s16 }
   0x2   :  { %s2049_s17 = scalar_lea.vmem %s20_s16, 8192  ;;  %p2054_p1 = scmp.lt.s32.totalorder %s20_s16, %s20_s16 }
   0x3   :  { %p2050_p0 = scmp.ne.s32.totalorder %s20_s16, %s2049_s17  ;;  %p2055_p2 = scmp.lt.s32.totalorder %s2049_s17, %s2049_s17 }
   0x5   :  { %p2056_p3 = por %p2055_p2, %p2054_p1 }
   0x7   :  { %p2057_p4 = pnand %p2056_p3, %p2050_p0 }
   0x9   :  { %2060 = shalt.err (!%p2057_p4)
}
   0xa   :  { %s2064_s18 = smov 512   ;;  %s2065_s19 = smov 32  }
   0xb   :  { %25 = dma.hbm_to_vmem [thread:$0]  %s3068_s2, 8192, %s20_s16, [#allocation4], %s2064_s18, %s2064_s18, %s2065_s19  }
   0xc   :  { %2061 = dma.done.wait [#allocation4], 8192  }
   0xd   :  { %2062 = vsyncadd [#allocation4], 4294959104  ;;  %v3071_v0 = vmov 0.0   ;;  %v40_v1 = vld [vmem:[%s3067_s1 + $0x8] sm:$0xff]  ;;  %v42_v2 = vld [vmem:[%s3067_s1 + $0x18] sm:$0xff]  ;;  %vm43_vm0 = vcmask 64512  }
   0xe   :  { %132 = vmatprep.mubr.f32.mxu0 %v3071_v0  ;;  %245 = vmatprep.mubr.f32.mxu1 %v3071_v0  ;;  %v39_v3 = vld [vmem:[%s3067_s1] sm:$0xff]  ;;  %v41_v4 = vld [vmem:[%s3067_s1 + $0x10] sm:$0xff]  ;;  %v2112_v6 = vld [vmem:[#allocation3 + $0x1e8] sm:$0xff]  ;;  %vm1796_vm1 = vcmask 7168  }
   0xf   :  { %98 = vmatprep.subr.mxu0 %v40_v1  ;;  %211 = vmatprep.subr.mxu1 %v42_v2  ;;  %v31_v5 = vld [vmem:[%s3066_s0] sm:$0xff]  ;;  %3154 = vst [vmem:[#allocation6_spill] sm:$0xff] %v2112_v6  ;;  %v2114_v7 = vld [vmem:[#allocation3 + $0x1f8] sm:$0xff]  ;;  %v2118_v9 = vld [vmem:[#allocation3 + $0x1f0] sm:$0xff] }
  0x10   :  { %99 = vmatpush1.msra.mxu0 %v39_v3  ;;  %212 = vmatpush1.msra.mxu1 %v41_v4  ;;  %3155 = vst [vmem:[#allocation7_spill] sm:$0xff] %v2114_v7  ;;  %v2116_v8 = vld [vmem:[#allocation3 + $0x1e0] sm:$0xff]  ;;  %v2122_v10 = vld [vmem:[#allocation3 + $0x1c8] sm:$0xff]  ;;  %v2124_v11 = vld [vmem:[#allocation3 + $0x1d8] sm:$0xff] }
  0x11   :  { %1803 = vmatmul.mubr.msk.f32.vlgmr.msra.gmra.mxu0 %vm43_vm0, %v31_v5  ;;  %1811 = vmatmul.mubr.msk.f32.vlgmr.msra.gmra.mxu1 %vm43_vm0, %v31_v5  ;;  %v2130_v12 = vld [vmem:[#allocation3 + $0x1c0] sm:$0xff]  ;;  %v2132_v13 = vld [vmem:[#allocation3 + $0x1d0] sm:$0xff]  ;;  %v32_v14 = vld [vmem:[%s3066_s0 + $0x8] sm:$0xff] }
  0x12   :  { %394 = vmatprep.subr.mxu0 %v2112_v6  ;;  %465 = vmatprep.subr.mxu1 %v2114_v7  ;;  %v2141_v15 = vld [vmem:[#allocation3 + $0x1a8] sm:$0xff]  ;;  %v2143_v16 = vld [vmem:[#allocation3 + $0x1b8] sm:$0xff]  ;;  %v2147_v17 = vld [vmem:[#allocation3 + $0x1a0] sm:$0xff] }
  0x13   :  { %395 = vmatpush1.msra.mxu0 %v2116_v8  ;;  %466 = vmatpush1.msra.mxu1 %v2118_v9  ;;  %v2149_v18 = vld [vmem:[#allocation3 + $0x1b0] sm:$0xff]  ;;  %v2153_v19 = vld [vmem:[#allocation3 + $0x188] sm:$0xff]  ;;  %v2155_v20 = vld [vmem:[#allocation3 + $0x198] sm:$0xff] }
  0x14   :  { %396 = vmatprep.subr.mxu0 %v2122_v10  ;;  %467 = vmatprep.subr.mxu1 %v2124_v11  ;;  %v2161_v21 = vld [vmem:[#allocation3 + $0x180] sm:$0xff]  ;;  %v2163_v22 = vld [vmem:[#allocation3 + $0x190] sm:$0xff]  ;;  %v2172_v24 = vld [vmem:[#allocation3 + $0x168] sm:$0xff] }
  0x15   :  { %138 = vmatprep.mubr.f32.mxu0 %v3071_v0  ;;  %251 = vmatprep.mubr.f32.mxu1 %v3071_v0  ;;  %v33_v23 = vld [vmem:[%s3066_s0 + $0x10] sm:$0xff]  ;;  %v2174_v25 = vld [vmem:[#allocation3 + $0x178] sm:$0xff]  ;;  %v2178_v26 = vld [vmem:[#allocation3 + $0x160] sm:$0xff] }
  0x16   :  { %397 = vmatpush1.msra.mxu0 %v2130_v12  ;;  %468 = vmatpush1.msra.mxu1 %v2132_v13  ;;  %v2180_v27 = vld [vmem:[#allocation3 + $0x170] sm:$0xff]  ;;  %v2184_v28 = vld [vmem:[#allocation3 + $0x148] sm:$0xff]  ;;  %v2186_v29 = vld [vmem:[#allocation3 + $0x158] sm:$0xff] }
  0x17   :  { %1804 = vmatmul.mubr.msk.f32.gmra.mxu0 %vm43_vm0, %v32_v14  ;;  %1812 = vmatmul.mubr.msk.f32.gmra.mxu1 %vm43_vm0, %v32_v14  ;;  %v2192_v30 = vld [vmem:[#allocation3 + $0x140] sm:$0xff]  ;;  %v2194_v31 = vld [vmem:[#allocation3 + $0x150] sm:$0xff]  ;;  %v34_v32 = vld [vmem:[%s3066_s0 + $0x18] sm:$0xff] }
  0x18   :  { %398 = vmatprep.subr.mxu0 %v2141_v15  ;;  %469 = vmatprep.subr.mxu1 %v2143_v16  ;;  %v2203_v33 = vld [vmem:[#allocation3 + $0x128] sm:$0xff]  ;;  %v2205_v34 = vld [vmem:[#allocation3 + $0x138] sm:$0xff]  ;;  %v2209_v35 = vld [vmem:[#allocation3 + $0x120] sm:$0xff] }
  0x19   :  { %399 = vmatpush1.msra.mxu0 %v2147_v17  ;;  %470 = vmatpush1.msra.mxu1 %v2149_v18  ;;  %v2211_v36 = vld [vmem:[#allocation3 + $0x130] sm:$0xff]  ;;  %v2215_v37 = vld [vmem:[#allocation3 + $0x108] sm:$0xff]  ;;  %v2217_v38 = vld [vmem:[#allocation3 + $0x118] sm:$0xff] }
  0x1a   :  { %400 = vmatprep.subr.mxu0 %v2153_v19  ;;  %471 = vmatprep.subr.mxu1 %v2155_v20  ;;  %v2223_v39 = vld [vmem:[#allocation3 + $0x100] sm:$0xff]  ;;  %v2225_v40 = vld [vmem:[#allocation3 + $0x110] sm:$0xff]  ;;  %v2234_v42 = vld [vmem:[#allocation3 + $0xe8] sm:$0xff] }
  0x1b   :  { %144 = vmatprep.mubr.f32.mxu0 %v3071_v0  ;;  %257 = vmatprep.mubr.f32.mxu1 %v3071_v0  ;;  %v35_v41 = vld [vmem:[%s3066_s0 + $0x20] sm:$0xff]  ;;  %v2236_v43 = vld [vmem:[#allocation3 + $0xf8] sm:$0xff]  ;;  %v2242_v45 = vld [vmem:[#allocation3 + $0xf0] sm:$0xff] }
  0x1c   :  { %401 = vmatpush1.msra.mxu0 %v2161_v21  ;;  %472 = vmatpush1.msra.mxu1 %v2163_v22  ;;  %v2240_v44 = vld [vmem:[#allocation3 + $0xe0] sm:$0xff]  ;;  %v2246_v46 = vld [vmem:[#allocation3 + $0xc8] sm:$0xff]  ;;  %v2248_v47 = vld [vmem:[#allocation3 + $0xd8] sm:$0xff] }
  0x1d   :  { %1805 = vmatmul.mubr.msk.f32.gmra.mxu0 %vm43_vm0, %v33_v23  ;;  %1813 = vmatmul.mubr.msk.f32.gmra.mxu1 %vm43_vm0, %v33_v23  ;;  %v2254_v48 = vld [vmem:[#allocation3 + $0xc0] sm:$0xff]  ;;  %v2256_v49 = vld [vmem:[#allocation3 + $0xd0] sm:$0xff]  ;;  %v36_v50 = vld [vmem:[%s3066_s0 + $0x28] sm:$0xff] }
  0x1e   :  { %402 = vmatprep.subr.mxu0 %v2172_v24  ;;  %473 = vmatprep.subr.mxu1 %v2174_v25  ;;  %v2265_v51 = vld [vmem:[#allocation3 + $0xa8] sm:$0xff]  ;;  %v2267_v52 = vld [vmem:[#allocation3 + $0xb8] sm:$0xff]  ;;  %v2271_v53 = vld [vmem:[#allocation3 + $0xa0] sm:$0xff] }
  0x1f   :  { %403 = vmatpush1.msra.mxu0 %v2178_v26  ;;  %474 = vmatpush1.msra.mxu1 %v2180_v27  ;;  %v2273_v54 = vld [vmem:[#allocation3 + $0xb0] sm:$0xff]  ;;  %v2277_v55 = vld [vmem:[#allocation3 + $0x88] sm:$0xff]  ;;  %v2279_v56 = vld [vmem:[#allocation3 + $0x98] sm:$0xff] }
  0x20   :  { %404 = vmatprep.subr.mxu0 %v2184_v28  ;;  %475 = vmatprep.subr.mxu1 %v2186_v29  ;;  %3156 = vst [vmem:[#allocation8_spill] sm:$0xff] %v2277_v55  ;;  %v2285_v57 = vld [vmem:[#allocation3 + $0x80] sm:$0xff]  ;;  %v2287_v58 = vld [vmem:[#allocation3 + $0x90] sm:$0xff]  ;;  %v2296_v60 = vld [vmem:[#allocation3 + $0x68] sm:$0xff] }
  0x21   :  { %150 = vmatprep.mubr.f32.mxu0 %v3071_v0  ;;  %263 = vmatprep.mubr.f32.mxu1 %v3071_v0  ;;  %3157 = vst [vmem:[#allocation9_spill] sm:$0xff] %v2287_v58  ;;  %v37_v59 = vld [vmem:[%s3066_s0 + $0x30] sm:$0xff]  ;;  %3158 = vst [vmem:[#allocation10_spill] sm:$0xff] %v2296_v60  ;;  %v2298_v61 = vld [vmem:[#allocation3 + $0x78] sm:$0xff] }
  0x22   :  { %405 = vmatpush1.msra.mxu0 %v2192_v30  ;;  %476 = vmatpush1.msra.mxu1 %v2194_v31  ;;  %3159 = vst [vmem:[#allocation11_spill] sm:$0xff] %v2298_v61  ;;  %v2302_v62 = vld [vmem:[#allocation3 + $0x60] sm:$0xff]  ;;  %v2304_v63 = vld [vmem:[#allocation3 + $0x70] sm:$0xff]  ;;  %v2308_v1 = vld [vmem:[#allocation3 + $0x48] sm:$0xff] }
  0x23   :  { %1806 = vmatmul.mubr.msk.f32.gmra.mxu0 %vm43_vm0, %v34_v32  ;;  %1814 = vmatmul.mubr.msk.f32.gmra.mxu1 %vm43_vm0, %v34_v32  ;;  %3160 = vst [vmem:[#allocation12_spill] sm:$0xff] %v2302_v62  ;;  %3161 = vst [vmem:[#allocation13_spill] sm:$0xff] %v2304_v63  ;;  %v2310_v2 = vld [vmem:[#allocation3 + $0x58] sm:$0xff]  ;;  %v2316_v3 = vld [vmem:[#allocation3 + $0x40] sm:$0xff] }
  0x24   :  { %406 = vmatprep.subr.mxu0 %v2203_v33  ;;  %477 = vmatprep.subr.mxu1 %v2205_v34  ;;  %3162 = vst [vmem:[#allocation14_spill] sm:$0xff] %v2308_v1  ;;  %3163 = vst [vmem:[#allocation15_spill] sm:$0xff] %v2310_v2  ;;  %v2318_v4 = vld [vmem:[#allocation3 + $0x50] sm:$0xff]  ;;  %v38_v5 = vld [vmem:[%s3066_s0 + $0x38] sm:$0xff] }
  0x25   :  { %407 = vmatpush1.msra.mxu0 %v2209_v35  ;;  %478 = vmatpush1.msra.mxu1 %v2211_v36  ;;  %3164 = vst [vmem:[#allocation16_spill] sm:$0xff] %v2316_v3  ;;  %3165 = vst [vmem:[#allocation17_spill] sm:$0xff] %v2318_v4  ;;  %v2327_v14 = vld [vmem:[#allocation3 + $0x28] sm:$0xff]  ;;  %v2329_v23 = vld [vmem:[#allocation3 + $0x38] sm:$0xff] }
  0x26   :  { %408 = vmatprep.subr.mxu0 %v2215_v37  ;;  %479 = vmatprep.subr.mxu1 %v2217_v38  ;;  %3166 = vst [vmem:[#allocation18_spill] sm:$0xff] %v2327_v14  ;;  %3167 = vst [vmem:[#allocation19_spill] sm:$0xff] %v2329_v23  ;;  %v2333_v32 = vld [vmem:[#allocation3 + $0x20] sm:$0xff] }
  0x27   :  { %156 = vmatprep.mubr.f32.mxu0 %v3071_v0  ;;  %269 = vmatprep.mubr.f32.mxu1 %v3071_v0  ;;  %3168 = vst [vmem:[#allocation20_spill] sm:$0xff] %v2333_v32 }
  0x28   :  { %409 = vmatpush1.msra.mxu0 %v2223_v39  ;;  %480 = vmatpush1.msra.mxu1 %v2225_v40 }
  0x29   :  { %1807 = vmatmul.mubr.msk.f32.gmra.mxu0 %vm43_vm0, %v35_v41  ;;  %1815 = vmatmul.mubr.msk.f32.gmra.mxu1 %vm43_vm0, %v35_v41  ;;  %v2335_v41 = vld [vmem:[#allocation3 + $0x30] sm:$0xff] }
  0x2a   :  { %410 = vmatprep.subr.mxu0 %v2234_v42  ;;  %481 = vmatprep.subr.mxu1 %v2236_v43  ;;  %3169 = vst [vmem:[#allocation21_spill] sm:$0xff] %v2335_v41 }
  0x2b   :  { %411 = vmatpush1.msra.mxu0 %v2240_v44  ;;  %482 = vmatpush1.msra.mxu1 %v2242_v45 }
  0x2c   :  { %412 = vmatprep.subr.mxu0 %v2246_v46  ;;  %483 = vmatprep.subr.mxu1 %v2248_v47 }
  0x2d   :  { %162 = vmatprep.mubr.f32.mxu0 %v3071_v0  ;;  %275 = vmatprep.mubr.f32.mxu1 %v3071_v0 }
  0x2e   :  { %413 = vmatpush1.msra.mxu0 %v2254_v48  ;;  %484 = vmatpush1.msra.mxu1 %v2256_v49 }
  0x2f   :  { %1808 = vmatmul.mubr.msk.f32.gmra.mxu0 %vm43_vm0, %v36_v50  ;;  %1816 = vmatmul.mubr.msk.f32.gmra.mxu1 %vm43_vm0, %v36_v50  ;;  %v2339_v50 = vld [vmem:[#allocation3 + $0x8] sm:$0xff] }
  0x30   :  { %414 = vmatprep.subr.mxu0 %v2265_v51  ;;  %485 = vmatprep.subr.mxu1 %v2267_v52  ;;  %3170 = vst [vmem:[#allocation22_spill] sm:$0xff] %v2339_v50 }
  0x31   :  { %415 = vmatpush1.msra.mxu0 %v2271_v53  ;;  %486 = vmatpush1.msra.mxu1 %v2273_v54 }
  0x32   :  { %416 = vmatprep.subr.mxu0 %v2277_v55  ;;  %487 = vmatprep.subr.mxu1 %v2279_v56 }
  0x33   :  { %168 = vmatprep.mubr.f32.mxu0 %v3071_v0  ;;  %281 = vmatprep.mubr.f32.mxu1 %v3071_v0 }
  0x34   :  { %417 = vmatpush1.msra.mxu0 %v2285_v57  ;;  %488 = vmatpush1.msra.mxu1 %v2287_v58 }
  0x35   :  { %1809 = vmatmul.mubr.msk.f32.gmra.mxu0 %vm43_vm0, %v37_v59  ;;  %1817 = vmatmul.mubr.msk.f32.gmra.mxu1 %vm43_vm0, %v37_v59  ;;  %v2341_v59 = vld [vmem:[#allocation3 + $0x18] sm:$0xff] }
  0x36   :  { %418 = vmatprep.subr.mxu0 %v2296_v60  ;;  %489 = vmatprep.subr.mxu1 %v2298_v61  ;;  %3171 = vst [vmem:[#allocation23_spill] sm:$0xff] %v2341_v59 }
  0x37   :  { %419 = vmatpush1.msra.mxu0 %v2302_v62  ;;  %490 = vmatpush1.msra.mxu1 %v2304_v63 }
  0x38   :  { %420 = vmatprep.subr.mxu0 %v2308_v1  ;;  %491 = vmatprep.subr.mxu1 %v2310_v2 }
  0x39   :  { %174 = vmatprep.mubr.f32.mxu0 %v3071_v0  ;;  %287 = vmatprep.mubr.f32.mxu1 %v3071_v0  ;;  %v2345_v0 = vld [vmem:[#allocation3] sm:$0xff] }
  0x3a   :  { %421 = vmatpush1.msra.mxu0 %v2316_v3  ;;  %492 = vmatpush1.msra.mxu1 %v2318_v4  ;;  %3172 = vst [vmem:[#allocation24_spill] sm:$0xff] %v2345_v0  ;;  %v2349_v4 = vld [vmem:[#allocation3 + $0x10] sm:$0xff] }
  0x3b   :  { %1810 = vmatmul.mubr.msk.f32.gmra.mxu0 %vm43_vm0, %v38_v5  ;;  %1818 = vmatmul.mubr.msk.f32.gmra.mxu1 %vm43_vm0, %v38_v5  ;;  %3173 = vst [vmem:[#allocation25_spill] sm:$0xff] %v2349_v4  ;;  %v3174_v5 = vmov 0.0  }
  0x3c   :  { %422 = vmatprep.subr.mxu0 %v2327_v14  ;;  %493 = vmatprep.subr.mxu1 %v2329_v23 }
  0x3d   :  { %423 = vmatpush1.msra.mxu0 %v2333_v32  ;;  %494 = vmatpush1.msra.mxu1 %v2335_v41 }
  0x3e   :  { %424 = vmatprep.subr.mxu0 %v2339_v50  ;;  %495 = vmatprep.subr.mxu1 %v2341_v59 }
  0x3f   :  { %425 = vmatpush1.msra.mxu0 %v2345_v0  ;;  %458 = vmatprep.mubr.f32.mxu0 %v3174_v5 }
  0x40   :  { %496 = vmatpush1.msra.mxu1 %v2349_v4  ;;  %529 = vmatprep.mubr.f32.mxu1 %v3174_v5 }
  0x41   :  { %459 = vmatmul.mubr.f32.vlgmr.msra.gmra.mxu0 %v3174_v5  ;;  %530 = vmatmul.mubr.f32.vlgmr.msra.gmra.mxu1 %v3174_v5 }
  0x42   :  { %568 = vmatprep.subr.mxu0 %v2112_v6  ;;  %639 = vmatprep.subr.mxu1 %v2114_v7 }
  0x43   :  { %569 = vmatpush1.msra.mxu0 %v2116_v8  ;;  %640 = vmatpush1.msra.mxu1 %v2118_v9 }
  0x44   :  { %570 = vmatprep.subr.mxu0 %v2122_v10  ;;  %641 = vmatprep.subr.mxu1 %v2124_v11 }
  0x45   :  { %571 = vmatpush1.msra.mxu0 %v2130_v12  ;;  %642 = vmatpush1.msra.mxu1 %v2132_v13 }
  0x46   :  { %572 = vmatprep.subr.mxu0 %v2141_v15  ;;  %643 = vmatprep.subr.mxu1 %v2143_v16 }
  0x47   :  { %573 = vmatpush1.msra.mxu0 %v2147_v17  ;;  %644 = vmatpush1.msra.mxu1 %v2149_v18 }
  0x48   :  { %574 = vmatprep.subr.mxu0 %v2153_v19  ;;  %645 = vmatprep.subr.mxu1 %v2155_v20 }
  0x49   :  { %575 = vmatpush1.msra.mxu0 %v2161_v21  ;;  %646 = vmatpush1.msra.mxu1 %v2163_v22 }
  0x4a   :  { %576 = vmatprep.subr.mxu0 %v2172_v24  ;;  %647 = vmatprep.subr.mxu1 %v2174_v25 }
  0x4b   :  { %577 = vmatpush1.msra.mxu0 %v2178_v26  ;;  %648 = vmatpush1.msra.mxu1 %v2180_v27 }
  0x4c   :  { %578 = vmatprep.subr.mxu0 %v2184_v28  ;;  %649 = vmatprep.subr.mxu1 %v2186_v29 }
  0x4d   :  { %579 = vmatpush1.msra.mxu0 %v2192_v30  ;;  %650 = vmatpush1.msra.mxu1 %v2194_v31 }
  0x4e   :  { %580 = vmatprep.subr.mxu0 %v2203_v33  ;;  %651 = vmatprep.subr.mxu1 %v2205_v34 }
  0x4f   :  { %581 = vmatpush1.msra.mxu0 %v2209_v35  ;;  %652 = vmatpush1.msra.mxu1 %v2211_v36 }
  0x50   :  { %582 = vmatprep.subr.mxu0 %v2215_v37  ;;  %653 = vmatprep.subr.mxu1 %v2217_v38 }
  0x51   :  { %583 = vmatpush1.msra.mxu0 %v2223_v39  ;;  %654 = vmatpush1.msra.mxu1 %v2225_v40 }
  0x52   :  { %584 = vmatprep.subr.mxu0 %v2234_v42  ;;  %655 = vmatprep.subr.mxu1 %v2236_v43 }
  0x53   :  { %585 = vmatpush1.msra.mxu0 %v2240_v44  ;;  %656 = vmatpush1.msra.mxu1 %v2242_v45 }
  0x54   :  { %586 = vmatprep.subr.mxu0 %v2246_v46  ;;  %657 = vmatprep.subr.mxu1 %v2248_v47 }
  0x55   :  { %587 = vmatpush1.msra.mxu0 %v2254_v48  ;;  %658 = vmatpush1.msra.mxu1 %v2256_v49 }
  0x56   :  { %588 = vmatprep.subr.mxu0 %v2265_v51  ;;  %659 = vmatprep.subr.mxu1 %v2267_v52 }
  0x57   :  { %589 = vmatpush1.msra.mxu0 %v2271_v53  ;;  %660 = vmatpush1.msra.mxu1 %v2273_v54 }
  0x58   :  { %590 = vmatprep.subr.mxu0 %v2277_v55  ;;  %661 = vmatprep.subr.mxu1 %v2279_v56  ;;  %v3175_v55 = vld [vmem:[#allocation17_spill] sm:$0xff] }
  0x59   :  { %591 = vmatpush1.msra.mxu0 %v2285_v57  ;;  %662 = vmatpush1.msra.mxu1 %v2287_v58 }
  0x5a   :  { %592 = vmatprep.subr.mxu0 %v2296_v60  ;;  %663 = vmatprep.subr.mxu1 %v2298_v61 }
  0x5b   :  { %593 = vmatpush1.msra.mxu0 %v2302_v62  ;;  %664 = vmatpush1.msra.mxu1 %v2304_v63 }
  0x5c   :  { %594 = vmatprep.subr.mxu0 %v2308_v1  ;;  %665 = vmatprep.subr.mxu1 %v2310_v2 }
  0x5d   :  { %595 = vmatpush1.msra.mxu0 %v2316_v3  ;;  %666 = vmatpush1.msra.mxu1 %v3175_v55 }
  0x5e   :  { %596 = vmatprep.subr.mxu0 %v2327_v14  ;;  %667 = vmatprep.subr.mxu1 %v2329_v23 }
  0x5f   :  { %597 = vmatpush1.msra.mxu0 %v2333_v32  ;;  %668 = vmatpush1.msra.mxu1 %v2335_v41 }
  0x60   :  { %598 = vmatprep.subr.mxu0 %v2339_v50  ;;  %669 = vmatprep.subr.mxu1 %v2341_v59 }
  0x61   :  { %599 = vmatpush1.msra.mxu0 %v2345_v0  ;;  %632 = vmatprep.mubr.f32.mxu0 %v3174_v5 }
  0x62   :  { %670 = vmatpush1.msra.mxu1 %v2349_v4  ;;  %703 = vmatprep.mubr.f32.mxu1 %v3174_v5 }
  0x63   :  { %742 = vmatprep.subr.mxu0 %v2112_v6  ;;  %813 = vmatprep.subr.mxu1 %v2114_v7 }
  0xd1   :  { %v134_v23 = vpop.f32.mrf.mxu0  ;;  %v247_v32 = vpop.f32.mrf.mxu1 }
  0xd3   :  { %v136_v14 = vpop.f32.mrf.mxu0  ;;  %v249_v41 = vpop.f32.mrf.mxu1 }
  0xd7   :  { %v2427_v55 = vpop.f32.mrf.mxu0  ;;  %v2429_v50 = vpop.f32.mrf.mxu1 }
  0xd8   :  { %3176 = vst [vmem:[#allocation26_spill] sm:$0xff] %v2427_v55  ;;  %3177 = vst [vmem:[#allocation27_spill] sm:$0xff] %v2429_v50 }
  0xd9   :  { %v2431_v59 = vpop.f32.mrf.mxu0  ;;  %v2433_v0 = vpop.f32.mrf.mxu1 }
  0xda   :  { %3178 = vst [vmem:[#allocation28_spill] sm:$0xff] %v2431_v59  ;;  %3179 = vst [vmem:[#allocation29_spill] sm:$0xff] %v2433_v0 }
  0xdd   :  { %v2435_v3 = vpop.f32.mrf.mxu0  ;;  %v2437_v4 = vpop.f32.mrf.mxu1 }
  0xde   :  { %3180 = vst [vmem:[#allocation30_spill] sm:$0xff] %v2435_v3  ;;  %3181 = vst [vmem:[#allocation31_spill] sm:$0xff] %v2437_v4 }
  0xdf   :  { %v2439_v5 = vpop.f32.mrf.mxu0  ;;  %v2441_v6 = vpop.f32.mrf.mxu1 }
  0xe0   :  { %3182 = vst [vmem:[#allocation32_spill] sm:$0xff] %v2439_v5  ;;  %3183 = vst [vmem:[#allocation33_spill] sm:$0xff] %v2441_v6 }
  0xe3   :  { %v2443_v7 = vpop.f32.mrf.mxu0  ;;  %v2445_v2 = vpop.f32.mrf.mxu1 }
  0xe4   :  { %3184 = vst [vmem:[#allocation34_spill] sm:$0xff] %v2443_v7  ;;  %3185 = vst [vmem:[#allocation35_spill] sm:$0xff] %v2445_v2 }
  0xe5   :  { %v2447_v1 = vpop.f32.mrf.mxu0  ;;  %v2449_v55 = vpop.f32.mrf.mxu1 }
  0xe6   :  { %3186 = vst [vmem:[#allocation36_spill] sm:$0xff] %v2447_v1  ;;  %3187 = vst [vmem:[#allocation37_spill] sm:$0xff] %v2449_v55 }
  0xe9   :  { %v2451_v50 = vpop.f32.mrf.mxu0  ;;  %v2453_v59 = vpop.f32.mrf.mxu1 }
  0xea   :  { %3188 = vst [vmem:[#allocation38_spill] sm:$0xff] %v2451_v50  ;;  %3189 = vst [vmem:[#allocation39_spill] sm:$0xff] %v2453_v59 }
  0xeb   :  { %v2455_v0 = vpop.f32.mrf.mxu0  ;;  %v2457_v3 = vpop.f32.mrf.mxu1 }
  0xec   :  { %3190 = vst [vmem:[#allocation40_spill] sm:$0xff] %v2455_v0  ;;  %3191 = vst [vmem:[#allocation41_spill] sm:$0xff] %v2457_v3 }
  0xef   :  { %v2459_v4 = vpop.f32.mrf.mxu0  ;;  %v2463_v6 = vpop.f32.mrf.mxu1 }
  0xf0   :  { %3192 = vst [vmem:[#allocation42_spill] sm:$0xff] %v2459_v4  ;;  %3194 = vst [vmem:[#allocation44_spill] sm:$0xff] %v2463_v6 }
  0xf1   :  { %v2461_v5 = vpop.f32.mrf.mxu0  ;;  %v2467_v2 = vpop.f32.mrf.mxu1 }
  0xf2   :  { %3193 = vst [vmem:[#allocation43_spill] sm:$0xff] %v2461_v5  ;;  %3196 = vst [vmem:[#allocation46_spill] sm:$0xff] %v2467_v2 }
  0xf5   :  { %v2465_v7 = vpop.f32.mrf.mxu0  ;;  %v2471_v55 = vpop.f32.mrf.mxu1 }
  0xf6   :  { %3195 = vst [vmem:[#allocation45_spill] sm:$0xff] %v2465_v7  ;;  %3198 = vst [vmem:[#allocation48_spill] sm:$0xff] %v2471_v55 }
  0xf7   :  { %v2469_v1 = vpop.f32.mrf.mxu0  ;;  %v2477_v0 = vpop.f32.mrf.mxu1 }
  0xf8   :  { %3197 = vst [vmem:[#allocation47_spill] sm:$0xff] %v2469_v1  ;;  %3201 = vst [vmem:[#allocation51_spill] sm:$0xff] %v2477_v0 }
  0xfb   :  { %v2473_v50 = vpop.f32.mrf.mxu0  ;;  %v2479_v4 = vpop.f32.mrf.mxu1 }
  0xfc   :  { %3199 = vst [vmem:[#allocation49_spill] sm:$0xff] %v2473_v50  ;;  %3202 = vst [vmem:[#allocation52_spill] sm:$0xff] %v2479_v4 }
  0xfd   :  { %v2475_v59 = vpop.f32.mrf.mxu0  ;;  %v2481_v7 = vpop.f32.mrf.mxu1 }
  0xfe   :  { %3200 = vst [vmem:[#allocation50_spill] sm:$0xff] %v2475_v59  ;;  %3203 = vst [vmem:[#allocation53_spill] sm:$0xff] %v2481_v7  ;;  %v3222_v7 = vld [vmem:[#allocation25_spill] sm:$0xff] }
 0x101   :  { %v460_v3 = vpop.f32.mrf.mxu0  ;;  %v531_v1 = vpop.f32.mrf.mxu1 }
 0x102   :  { %v536_v5 = vadd.f32 %v460_v3, %v134_v23  ;;  %v538_v55 = vadd.f32 %v531_v1, %v247_v32  ;;  %v3206_v1 = vld [vmem:[#allocation10_spill] sm:$0xff]  ;;  %v3208_v32 = vld [vmem:[#allocation12_spill] sm:$0xff] }
 0x103   :  { %v462_v63 = vpop.f32.mrf.mxu0  ;;  %v533_v61 = vpop.f32.mrf.mxu1 }
 0x104   :  { %v1819_v6 = vmul.f32 -1.442695, %v536_v5  ;;  %v537_v62 = vadd.f32 %v462_v63, %v136_v14  ;;  %v1821_v50 = vmul.f32 -1.442695, %v538_v55  ;;  %v539_v59 = vadd.f32 %v533_v61, %v249_v41  ;;  %v3209_v41 = vld [vmem:[#allocation13_spill] sm:$0xff] }
 0x106   :  { %1849 = vpow2.f32 %v1819_v6  ;;  %v1820_v2 = vmul.f32 -1.442695, %v537_v62 }
 0x108   :  { %1851 = vpow2.f32 %v1820_v2 }
 0x109   :  { %1853 = vpow2.f32 %v1821_v50  ;;  %v3210_v50 = vld [vmem:[#allocation14_spill] sm:$0xff] }
 0x113   :  { %v1850_v60 = vpop.eup %1849 }
 0x114   :  { %v549_v58 = vadd.f32 1.0, %v1850_v60 }
 0x115   :  { %v1852_v0 = vpop.eup %1851 }
 0x116   :  { %1855 = vrcp.f32 %v549_v58  ;;  %v550_v4 = vadd.f32 1.0, %v1852_v0  ;;  %v1854_v3 = vpop.eup %1853  ;;  %v3204_v0 = vld [vmem:[#allocation8_spill] sm:$0xff]  ;;  %v3205_v58 = vld [vmem:[#allocation9_spill] sm:$0xff] }
 0x117   :  { %1857 = vtanh.f32 %v539_v59  ;;  %v551_v6 = vadd.f32 1.0, %v1854_v3  ;;  %v3211_v59 = vld [vmem:[#allocation15_spill] sm:$0xff]  ;;  %v3212_v3 = vld [vmem:[#allocation16_spill] sm:$0xff] }
 0x118   :  { %1859 = vrcp.f32 %v550_v4  ;;  %v3207_v4 = vld [vmem:[#allocation11_spill] sm:$0xff] }
 0x119   :  { %1861 = vrcp.f32 %v551_v6  ;;  %v3216_v6 = vld [vmem:[#allocation20_spill] sm:$0xff] }
 0x123   :  { %v1856_v63 = vpop.eup %1855 }
 0x124   :  { %v1858_v14 = vpop.eup %1857 }
 0x125   :  { %v1860_v23 = vpop.eup %1859  ;;  %v560_v2 = vmul.f32 %v1858_v14, %v1856_v63  ;;  %v3213_v63 = vld [vmem:[#allocation17_spill] sm:$0xff]  ;;  %v3214_v14 = vld [vmem:[#allocation18_spill] sm:$0xff] }
 0x126   :  { %v559_v62 = vmul.f32 0.0, %v1860_v23  ;;  %v1862_v55 = vpop.eup %1861  ;;  %v3215_v23 = vld [vmem:[#allocation19_spill] sm:$0xff] }
 0x128   :  { %v2483_v5 = vadd.f32 %v560_v2, %v559_v62  ;;  %v3217_v62 = vld [vmem:[#allocation21_spill] sm:$0xff]  ;;  %v3218_v2 = vld [vmem:[#allocation22_spill] sm:$0xff] }
 0x12a   :  { %1863 = vtanh.f32 %v2483_v5 }
 0x137   :  { %v1864_v60 = vpop.eup %1863 }
 0x138   :  { %v563_v61 = vmul.f32 %v1864_v60, %v1862_v55  ;;  %v3219_v55 = vld [vmem:[#allocation23_spill] sm:$0xff]  ;;  %v3220_v60 = vld [vmem:[#allocation24_spill] sm:$0xff] }
 0x13a   :  { %633 = vmatmul.mubr.f32.vlgmr.msra.gmra.mxu0 %v563_v61  ;;  %704 = vmatmul.mubr.f32.vlgmr.msra.gmra.mxu1 %v563_v61  ;;  %v3221_v61 = vmov 0.0  }
 0x13b   :  { %743 = vmatpush1.msra.mxu0 %v2116_v8  ;;  %814 = vmatpush1.msra.mxu1 %v2118_v9 }
 0x13c   :  { %744 = vmatprep.subr.mxu0 %v2122_v10  ;;  %815 = vmatprep.subr.mxu1 %v2124_v11 }
 0x13d   :  { %745 = vmatpush1.msra.mxu0 %v2130_v12  ;;  %816 = vmatpush1.msra.mxu1 %v2132_v13 }
 0x13e   :  { %746 = vmatprep.subr.mxu0 %v2141_v15  ;;  %817 = vmatprep.subr.mxu1 %v2143_v16 }
 0x13f   :  { %747 = vmatpush1.msra.mxu0 %v2147_v17  ;;  %818 = vmatpush1.msra.mxu1 %v2149_v18 }
 0x140   :  { %748 = vmatprep.subr.mxu0 %v2153_v19  ;;  %819 = vmatprep.subr.mxu1 %v2155_v20 }
 0x141   :  { %749 = vmatpush1.msra.mxu0 %v2161_v21  ;;  %820 = vmatpush1.msra.mxu1 %v2163_v22 }
 0x142   :  { %750 = vmatprep.subr.mxu0 %v2172_v24  ;;  %821 = vmatprep.subr.mxu1 %v2174_v25 }
 0x143   :  { %751 = vmatpush1.msra.mxu0 %v2178_v26  ;;  %822 = vmatpush1.msra.mxu1 %v2180_v27 }
 0x144   :  { %752 = vmatprep.subr.mxu0 %v2184_v28  ;;  %823 = vmatprep.subr.mxu1 %v2186_v29 }
 0x145   :  { %753 = vmatpush1.msra.mxu0 %v2192_v30  ;;  %824 = vmatpush1.msra.mxu1 %v2194_v31 }
 0x146   :  { %754 = vmatprep.subr.mxu0 %v2203_v33  ;;  %825 = vmatprep.subr.mxu1 %v2205_v34 }
 0x147   :  { %755 = vmatpush1.msra.mxu0 %v2209_v35  ;;  %826 = vmatpush1.msra.mxu1 %v2211_v36 }
 0x148   :  { %756 = vmatprep.subr.mxu0 %v2215_v37  ;;  %827 = vmatprep.subr.mxu1 %v2217_v38 }
 0x149   :  { %757 = vmatpush1.msra.mxu0 %v2223_v39  ;;  %828 = vmatpush1.msra.mxu1 %v2225_v40 }
 0x14a   :  { %758 = vmatprep.subr.mxu0 %v2234_v42  ;;  %829 = vmatprep.subr.mxu1 %v2236_v43 }
 0x14b   :  { %759 = vmatpush1.msra.mxu0 %v2240_v44  ;;  %830 = vmatpush1.msra.mxu1 %v2242_v45 }
 0x14c   :  { %760 = vmatprep.subr.mxu0 %v2246_v46  ;;  %831 = vmatprep.subr.mxu1 %v2248_v47 }
 0x14d   :  { %761 = vmatpush1.msra.mxu0 %v2254_v48  ;;  %832 = vmatpush1.msra.mxu1 %v2256_v49 }
 0x14e   :  { %762 = vmatprep.subr.mxu0 %v2265_v51  ;;  %833 = vmatprep.subr.mxu1 %v2267_v52 }
 0x14f   :  { %763 = vmatpush1.msra.mxu0 %v2271_v53  ;;  %834 = vmatpush1.msra.mxu1 %v2273_v54 }
 0x150   :  { %764 = vmatprep.subr.mxu0 %v3204_v0  ;;  %835 = vmatprep.subr.mxu1 %v2279_v56 }
 0x151   :  { %765 = vmatpush1.msra.mxu0 %v2285_v57  ;;  %836 = vmatpush1.msra.mxu1 %v3205_v58 }
 0x152   :  { %766 = vmatprep.subr.mxu0 %v3206_v1  ;;  %837 = vmatprep.subr.mxu1 %v3207_v4  ;;  %v3228_v1 = vld [vmem:[#allocation29_spill] sm:$0xff] }
 0x153   :  { %767 = vmatpush1.msra.mxu0 %v3208_v32  ;;  %838 = vmatpush1.msra.mxu1 %v3209_v41  ;;  %v3227_v41 = vld [vmem:[#allocation27_spill] sm:$0xff] }
 0x154   :  { %768 = vmatprep.subr.mxu0 %v3210_v50  ;;  %839 = vmatprep.subr.mxu1 %v3211_v59 }
 0x155   :  { %769 = vmatpush1.msra.mxu0 %v3212_v3  ;;  %840 = vmatpush1.msra.mxu1 %v3213_v63  ;;  %v3223_v63 = vld [vmem:[#allocation6_spill] sm:$0xff] }
 0x156   :  { %770 = vmatprep.subr.mxu0 %v3214_v14  ;;  %841 = vmatprep.subr.mxu1 %v3215_v23  ;;  %v3224_v14 = vld [vmem:[#allocation7_spill] sm:$0xff] }
 0x157   :  { %771 = vmatpush1.msra.mxu0 %v3216_v6  ;;  %842 = vmatpush1.msra.mxu1 %v3217_v62  ;;  %v3225_v6 = vld [vmem:[#allocation26_spill] sm:$0xff] }
 0x158   :  { %772 = vmatprep.subr.mxu0 %v3218_v2  ;;  %843 = vmatprep.subr.mxu1 %v3219_v55  ;;  %v3226_v2 = vld [vmem:[#allocation28_spill] sm:$0xff] }
 0x159   :  { %773 = vmatpush1.msra.mxu0 %v3220_v60  ;;  %806 = vmatprep.mubr.f32.mxu0 %v3221_v61 }
 0x15a   :  { %844 = vmatpush1.msra.mxu1 %v3222_v7  ;;  %877 = vmatprep.mubr.f32.mxu1 %v3221_v61 }
 0x15b   :  { %916 = vmatprep.subr.mxu0 %v3223_v63  ;;  %987 = vmatprep.subr.mxu1 %v3224_v14 }
 0x1fa   :  { %v634_v23 = vpop.f32.mrf.mxu0  ;;  %v705_v60 = vpop.f32.mrf.mxu1 }
 0x1fb   :  { %v710_v3 = vadd.f32 %v634_v23, %v3225_v6  ;;  %v712_v32 = vadd.f32 %v705_v60, %v3227_v41  ;;  %v3234_v60 = vld [vmem:[#allocation14_spill] sm:$0xff] }
 0x1fc   :  { %v636_v62 = vpop.f32.mrf.mxu0  ;;  %v707_v7 = vpop.f32.mrf.mxu1 }
 0x1fd   :  { %v1822_v59 = vmul.f32 -1.442695, %v710_v3  ;;  %v711_v50 = vadd.f32 %v636_v62, %v3226_v2  ;;  %v1824_v4 = vmul.f32 -1.442695, %v712_v32  ;;  %v713_v63 = vadd.f32 %v707_v7, %v3228_v1  ;;  %v3231_v32 = vld [vmem:[#allocation11_spill] sm:$0xff] }
 0x1ff   :  { %1865 = vpow2.f32 %v1822_v59  ;;  %v1823_v55 = vmul.f32 -1.442695, %v711_v50 }
 0x201   :  { %1867 = vpow2.f32 %v1823_v55 }
 0x202   :  { %1869 = vpow2.f32 %v1824_v4 }
 0x20c   :  { %v1866_v61 = vpop.eup %1865 }
 0x20d   :  { %v723_v58 = vadd.f32 1.0, %v1866_v61  ;;  %v3235_v61 = vld [vmem:[#allocation15_spill] sm:$0xff] }
 0x20e   :  { %v1868_v14 = vpop.eup %1867 }
 0x20f   :  { %1871 = vrcp.f32 %v723_v58  ;;  %v724_v23 = vadd.f32 1.0, %v1868_v14  ;;  %v1870_v3 = vpop.eup %1869  ;;  %v3230_v58 = vld [vmem:[#allocation10_spill] sm:$0xff]  ;;  %v3233_v14 = vld [vmem:[#allocation13_spill] sm:$0xff] }
 0x210   :  { %1873 = vtanh.f32 %v713_v63  ;;  %v725_v62 = vadd.f32 1.0, %v1870_v3  ;;  %v3232_v63 = vld [vmem:[#allocation12_spill] sm:$0xff]  ;;  %v3237_v3 = vld [vmem:[#allocation17_spill] sm:$0xff] }
 0x211   :  { %1875 = vrcp.f32 %v724_v23  ;;  %v3236_v23 = vld [vmem:[#allocation16_spill] sm:$0xff] }
 0x212   :  { %1877 = vrcp.f32 %v725_v62  ;;  %v3241_v62 = vld [vmem:[#allocation21_spill] sm:$0xff] }
 0x21c   :  { %v1872_v6 = vpop.eup %1871 }
 0x21d   :  { %v1874_v59 = vpop.eup %1873 }
 0x21e   :  { %v1876_v50 = vpop.eup %1875  ;;  %v734_v41 = vmul.f32 %v1874_v59, %v1872_v6  ;;  %v3238_v6 = vld [vmem:[#allocation18_spill] sm:$0xff]  ;;  %v3239_v59 = vld [vmem:[#allocation19_spill] sm:$0xff] }
 0x21f   :  { %v733_v2 = vmul.f32 %v1876_v50, %v2483_v5  ;;  %v1878_v7 = vpop.eup %1877  ;;  %v3229_v5 = vld [vmem:[#allocation9_spill] sm:$0xff]  ;;  %v3240_v50 = vld [vmem:[#allocation20_spill] sm:$0xff] }
 0x221   :  { %v2557_v55 = vadd.f32 %v734_v41, %v733_v2  ;;  %v3242_v2 = vld [vmem:[#allocation22_spill] sm:$0xff]  ;;  %v3243_v41 = vld [vmem:[#allocation23_spill] sm:$0xff] }
 0x223   :  { %1879 = vtanh.f32 %v2557_v55 }
 0x230   :  { %v1880_v1 = vpop.eup %1879 }
 0x231   :  { %v737_v4 = vmul.f32 %v1880_v1, %v1878_v7  ;;  %v3244_v7 = vld [vmem:[#allocation24_spill] sm:$0xff]  ;;  %v3245_v1 = vmov 0.0  }
 0x233   :  { %807 = vmatmul.mubr.f32.vlgmr.msra.gmra.mxu0 %v737_v4  ;;  %878 = vmatmul.mubr.f32.vlgmr.msra.gmra.mxu1 %v737_v4  ;;  %v3246_v4 = vld [vmem:[#allocation25_spill] sm:$0xff] }
 0x234   :  { %917 = vmatpush1.msra.mxu0 %v2116_v8  ;;  %988 = vmatpush1.msra.mxu1 %v2118_v9 }
 0x235   :  { %918 = vmatprep.subr.mxu0 %v2122_v10  ;;  %989 = vmatprep.subr.mxu1 %v2124_v11 }
 0x236   :  { %919 = vmatpush1.msra.mxu0 %v2130_v12  ;;  %990 = vmatpush1.msra.mxu1 %v2132_v13 }
 0x237   :  { %920 = vmatprep.subr.mxu0 %v2141_v15  ;;  %991 = vmatprep.subr.mxu1 %v2143_v16 }
 0x238   :  { %921 = vmatpush1.msra.mxu0 %v2147_v17  ;;  %992 = vmatpush1.msra.mxu1 %v2149_v18 }
 0x239   :  { %922 = vmatprep.subr.mxu0 %v2153_v19  ;;  %993 = vmatprep.subr.mxu1 %v2155_v20 }
 0x23a   :  { %923 = vmatpush1.msra.mxu0 %v2161_v21  ;;  %994 = vmatpush1.msra.mxu1 %v2163_v22 }
 0x23b   :  { %924 = vmatprep.subr.mxu0 %v2172_v24  ;;  %995 = vmatprep.subr.mxu1 %v2174_v25 }
 0x23c   :  { %925 = vmatpush1.msra.mxu0 %v2178_v26  ;;  %996 = vmatpush1.msra.mxu1 %v2180_v27 }
 0x23d   :  { %926 = vmatprep.subr.mxu0 %v2184_v28  ;;  %997 = vmatprep.subr.mxu1 %v2186_v29 }
 0x23e   :  { %927 = vmatpush1.msra.mxu0 %v2192_v30  ;;  %998 = vmatpush1.msra.mxu1 %v2194_v31 }
 0x23f   :  { %928 = vmatprep.subr.mxu0 %v2203_v33  ;;  %999 = vmatprep.subr.mxu1 %v2205_v34 }
 0x240   :  { %929 = vmatpush1.msra.mxu0 %v2209_v35  ;;  %1000 = vmatpush1.msra.mxu1 %v2211_v36 }
 0x241   :  { %930 = vmatprep.subr.mxu0 %v2215_v37  ;;  %1001 = vmatprep.subr.mxu1 %v2217_v38 }
 0x242   :  { %931 = vmatpush1.msra.mxu0 %v2223_v39  ;;  %1002 = vmatpush1.msra.mxu1 %v2225_v40 }
 0x243   :  { %932 = vmatprep.subr.mxu0 %v2234_v42  ;;  %1003 = vmatprep.subr.mxu1 %v2236_v43 }
 0x244   :  { %933 = vmatpush1.msra.mxu0 %v2240_v44  ;;  %1004 = vmatpush1.msra.mxu1 %v2242_v45 }
 0x245   :  { %934 = vmatprep.subr.mxu0 %v2246_v46  ;;  %1005 = vmatprep.subr.mxu1 %v2248_v47 }
 0x246   :  { %935 = vmatpush1.msra.mxu0 %v2254_v48  ;;  %1006 = vmatpush1.msra.mxu1 %v2256_v49 }
 0x247   :  { %936 = vmatprep.subr.mxu0 %v2265_v51  ;;  %1007 = vmatprep.subr.mxu1 %v2267_v52 }
 0x248   :  { %937 = vmatpush1.msra.mxu0 %v2271_v53  ;;  %1008 = vmatpush1.msra.mxu1 %v2273_v54 }
 0x249   :  { %938 = vmatprep.subr.mxu0 %v3204_v0  ;;  %1009 = vmatprep.subr.mxu1 %v2279_v56 }
 0x24a   :  { %939 = vmatpush1.msra.mxu0 %v2285_v57  ;;  %1010 = vmatpush1.msra.mxu1 %v3229_v5 }
 0x24b   :  { %940 = vmatprep.subr.mxu0 %v3230_v58  ;;  %1011 = vmatprep.subr.mxu1 %v3231_v32  ;;  %v3252_v58 = vld [vmem:[#allocation33_spill] sm:$0xff] }
 0x24c   :  { %941 = vmatpush1.msra.mxu0 %v3232_v63  ;;  %1012 = vmatpush1.msra.mxu1 %v3233_v14  ;;  %v3251_v14 = vld [vmem:[#allocation31_spill] sm:$0xff] }
 0x24d   :  { %942 = vmatprep.subr.mxu0 %v3234_v60  ;;  %1013 = vmatprep.subr.mxu1 %v3235_v61 }
 0x24e   :  { %943 = vmatpush1.msra.mxu0 %v3236_v23  ;;  %1014 = vmatpush1.msra.mxu1 %v3237_v3  ;;  %v3247_v3 = vld [vmem:[#allocation6_spill] sm:$0xff] }
 0x24f   :  { %944 = vmatprep.subr.mxu0 %v3238_v6  ;;  %1015 = vmatprep.subr.mxu1 %v3239_v59  ;;  %v3248_v6 = vld [vmem:[#allocation7_spill] sm:$0xff] }
 0x250   :  { %945 = vmatpush1.msra.mxu0 %v3240_v50  ;;  %1016 = vmatpush1.msra.mxu1 %v3241_v62  ;;  %v3249_v50 = vld [vmem:[#allocation30_spill] sm:$0xff] }
 0x251   :  { %946 = vmatprep.subr.mxu0 %v3242_v2  ;;  %1017 = vmatprep.subr.mxu1 %v3243_v41  ;;  %v3250_v2 = vld [vmem:[#allocation32_spill] sm:$0xff] }
 0x252   :  { %947 = vmatpush1.msra.mxu0 %v3244_v7  ;;  %980 = vmatprep.mubr.f32.mxu0 %v3245_v1 }
 0x253   :  { %1018 = vmatpush1.msra.mxu1 %v3246_v4  ;;  %1051 = vmatprep.mubr.f32.mxu1 %v3245_v1 }
 0x254   :  { %1090 = vmatprep.subr.mxu0 %v3247_v3  ;;  %1161 = vmatprep.subr.mxu1 %v3248_v6 }
 0x2f3   :  { %v808_v59 = vpop.f32.mrf.mxu0  ;;  %v879_v7 = vpop.f32.mrf.mxu1 }
 0x2f4   :  { %v884_v23 = vadd.f32 %v808_v59, %v3249_v50  ;;  %v886_v63 = vadd.f32 %v879_v7, %v3251_v14 }
 0x2f5   :  { %v810_v62 = vpop.f32.mrf.mxu0  ;;  %v881_v4 = vpop.f32.mrf.mxu1 }
 0x2f6   :  { %v1825_v61 = vmul.f32 -1.442695, %v884_v23  ;;  %v885_v60 = vadd.f32 %v810_v62, %v3250_v2  ;;  %v1827_v32 = vmul.f32 -1.442695, %v886_v63  ;;  %v887_v3 = vadd.f32 %v881_v4, %v3252_v58 }
 0x2f8   :  { %1881 = vpow2.f32 %v1825_v61  ;;  %v1826_v41 = vmul.f32 -1.442695, %v885_v60 }
 0x2fa   :  { %1883 = vpow2.f32 %v1826_v41 }
 0x2fb   :  { %1885 = vpow2.f32 %v1827_v32 }
 0x305   :  { %v1882_v1 = vpop.eup %1881 }
 0x306   :  { %v897_v5 = vadd.f32 1.0, %v1882_v1 }
 0x307   :  { %v1884_v6 = vpop.eup %1883 }
 0x308   :  { %1887 = vrcp.f32 %v897_v5  ;;  %v898_v59 = vadd.f32 1.0, %v1884_v6  ;;  %v1886_v23 = vpop.eup %1885  ;;  %v2715_v6 = vld [vmem:[#allocation3 + $0x1f0] sm:$0xff] }
 0x309   :  { %1889 = vtanh.f32 %v887_v3  ;;  %v899_v62 = vadd.f32 1.0, %v1886_v23  ;;  %v2712_v3 = vld [vmem:[#allocation3 + $0x1e0] sm:$0xff]  ;;  %v2721_v23 = vld [vmem:[#allocation3 + $0x1d8] sm:$0xff] }
 0x30a   :  { %1891 = vrcp.f32 %v898_v59  ;;  %v2718_v59 = vld [vmem:[#allocation3 + $0x1c8] sm:$0xff] }
 0x30b   :  { %1893 = vrcp.f32 %v899_v62  ;;  %v2733_v62 = vld [vmem:[#allocation3 + $0x1b8] sm:$0xff] }
 0x315   :  { %v1888_v50 = vpop.eup %1887 }
 0x316   :  { %v1890_v61 = vpop.eup %1889 }
 0x317   :  { %v1892_v60 = vpop.eup %1891  ;;  %v908_v14 = vmul.f32 %v1890_v61, %v1888_v50  ;;  %v2724_v50 = vld [vmem:[#allocation3 + $0x1c0] sm:$0xff]  ;;  %v2727_v61 = vld [vmem:[#allocation3 + $0x1d0] sm:$0xff] }
 0x318   :  { %v907_v2 = vmul.f32 %v1892_v60, %v2557_v55  ;;  %v1894_v58 = vpop.eup %1893  ;;  %v2730_v60 = vld [vmem:[#allocation3 + $0x1a8] sm:$0xff] }
 0x31a   :  { %v2631_v41 = vadd.f32 %v908_v14, %v907_v2  ;;  %v2736_v2 = vld [vmem:[#allocation3 + $0x1a0] sm:$0xff]  ;;  %v2739_v14 = vld [vmem:[#allocation3 + $0x1b0] sm:$0xff] }
 0x31c   :  { %1895 = vtanh.f32 %v2631_v41 }
 0x329   :  { %v1896_v63 = vpop.eup %1895 }
 0x32a   :  { %v911_v32 = vmul.f32 %v1896_v63, %v1894_v58  ;;  %v2745_v58 = vld [vmem:[#allocation3 + $0x198] sm:$0xff]  ;;  %v2748_v63 = vld [vmem:[#allocation3 + $0x180] sm:$0xff] }
 0x32c   :  { %981 = vmatmul.mubr.f32.vlgmr.msra.gmra.mxu0 %v911_v32  ;;  %1052 = vmatmul.mubr.f32.vlgmr.msra.gmra.mxu1 %v911_v32  ;;  %v2751_v32 = vld [vmem:[#allocation3 + $0x190] sm:$0xff] }
 0x32d   :  { %1091 = vmatpush1.msra.mxu0 %v2116_v8  ;;  %1162 = vmatpush1.msra.mxu1 %v2118_v9  ;;  %v3253_v8 = vld [vmem:[#allocation9_spill] sm:$0xff]  ;;  %v3254_v9 = vld [vmem:[#allocation10_spill] sm:$0xff] }
 0x32e   :  { %1092 = vmatprep.subr.mxu0 %v2122_v10  ;;  %1163 = vmatprep.subr.mxu1 %v2124_v11  ;;  %v3255_v10 = vld [vmem:[#allocation11_spill] sm:$0xff]  ;;  %v3256_v11 = vld [vmem:[#allocation12_spill] sm:$0xff] }
 0x32f   :  { %1093 = vmatpush1.msra.mxu0 %v2130_v12  ;;  %1164 = vmatpush1.msra.mxu1 %v2132_v13  ;;  %v3257_v12 = vld [vmem:[#allocation13_spill] sm:$0xff]  ;;  %v3258_v13 = vld [vmem:[#allocation14_spill] sm:$0xff] }
 0x330   :  { %1094 = vmatprep.subr.mxu0 %v2141_v15  ;;  %1165 = vmatprep.subr.mxu1 %v2143_v16  ;;  %v3259_v15 = vld [vmem:[#allocation15_spill] sm:$0xff]  ;;  %v3260_v16 = vld [vmem:[#allocation16_spill] sm:$0xff] }
 0x331   :  { %1095 = vmatpush1.msra.mxu0 %v2147_v17  ;;  %1166 = vmatpush1.msra.mxu1 %v2149_v18  ;;  %v3261_v17 = vld [vmem:[#allocation17_spill] sm:$0xff]  ;;  %v3262_v18 = vld [vmem:[#allocation18_spill] sm:$0xff] }
 0x332   :  { %1096 = vmatprep.subr.mxu0 %v2153_v19  ;;  %1167 = vmatprep.subr.mxu1 %v2155_v20  ;;  %v3263_v19 = vld [vmem:[#allocation19_spill] sm:$0xff]  ;;  %v3264_v20 = vld [vmem:[#allocation20_spill] sm:$0xff] }
 0x333   :  { %1097 = vmatpush1.msra.mxu0 %v2161_v21  ;;  %1168 = vmatpush1.msra.mxu1 %v2163_v22  ;;  %v3265_v21 = vld [vmem:[#allocation21_spill] sm:$0xff]  ;;  %v3266_v22 = vld [vmem:[#allocation22_spill] sm:$0xff] }
 0x334   :  { %1098 = vmatprep.subr.mxu0 %v2172_v24  ;;  %1169 = vmatprep.subr.mxu1 %v2174_v25  ;;  %v3267_v24 = vld [vmem:[#allocation23_spill] sm:$0xff]  ;;  %v3268_v25 = vld [vmem:[#allocation24_spill] sm:$0xff] }
 0x335   :  { %1099 = vmatpush1.msra.mxu0 %v2178_v26  ;;  %1170 = vmatpush1.msra.mxu1 %v2180_v27  ;;  %v3269_v26 = vmov 0.0   ;;  %v3270_v27 = vld [vmem:[#allocation25_spill] sm:$0xff] }
 0x336   :  { %1100 = vmatprep.subr.mxu0 %v2184_v28  ;;  %1171 = vmatprep.subr.mxu1 %v2186_v29  ;;  %v2698_v28 = vld [vmem:[#allocation3 + $0x1e8] sm:$0xff]  ;;  %v2701_v29 = vld [vmem:[#allocation3 + $0x1f8] sm:$0xff] }
 0x337   :  { %1101 = vmatpush1.msra.mxu0 %v2192_v30  ;;  %1172 = vmatpush1.msra.mxu1 %v2194_v31  ;;  %3271 = vst [vmem:[#allocation8_spill] sm:$0xff] %v2698_v28  ;;  %3272 = vst [vmem:[#allocation26_spill] sm:$0xff] %v2701_v29  ;;  %v3273_v31 = vld [vmem:[#allocation34_spill] sm:$0xff] }
 0x338   :  { %1102 = vmatprep.subr.mxu0 %v2203_v33  ;;  %1173 = vmatprep.subr.mxu1 %v2205_v34 }
 0x339   :  { %1103 = vmatpush1.msra.mxu0 %v2209_v35  ;;  %1174 = vmatpush1.msra.mxu1 %v2211_v36  ;;  %v3274_v36 = vld [vmem:[#allocation36_spill] sm:$0xff] }
 0x33a   :  { %1104 = vmatprep.subr.mxu0 %v2215_v37  ;;  %1175 = vmatprep.subr.mxu1 %v2217_v38 }
 0x33b   :  { %1105 = vmatpush1.msra.mxu0 %v2223_v39  ;;  %1176 = vmatpush1.msra.mxu1 %v2225_v40  ;;  %v3275_v40 = vld [vmem:[#allocation35_spill] sm:$0xff] }
 0x33c   :  { %1106 = vmatprep.subr.mxu0 %v2234_v42  ;;  %1177 = vmatprep.subr.mxu1 %v2236_v43 }
 0x33d   :  { %1107 = vmatpush1.msra.mxu0 %v2240_v44  ;;  %1178 = vmatpush1.msra.mxu1 %v2242_v45 }
 0x33e   :  { %1108 = vmatprep.subr.mxu0 %v2246_v46  ;;  %1179 = vmatprep.subr.mxu1 %v2248_v47  ;;  %v3276_v46 = vld [vmem:[#allocation37_spill] sm:$0xff] }
 0x33f   :  { %1109 = vmatpush1.msra.mxu0 %v2254_v48  ;;  %1180 = vmatpush1.msra.mxu1 %v2256_v49 }
 0x340   :  { %1110 = vmatprep.subr.mxu0 %v2265_v51  ;;  %1181 = vmatprep.subr.mxu1 %v2267_v52 }
 0x341   :  { %1111 = vmatpush1.msra.mxu0 %v2271_v53  ;;  %1182 = vmatpush1.msra.mxu1 %v2273_v54 }
 0x342   :  { %1112 = vmatprep.subr.mxu0 %v3204_v0  ;;  %1183 = vmatprep.subr.mxu1 %v2279_v56 }
 0x343   :  { %1113 = vmatpush1.msra.mxu0 %v2285_v57  ;;  %1184 = vmatpush1.msra.mxu1 %v3253_v8  ;;  %v2754_v8 = vld [vmem:[#allocation3 + $0x168] sm:$0xff] }
 0x344   :  { %1114 = vmatprep.subr.mxu0 %v3254_v9  ;;  %1185 = vmatprep.subr.mxu1 %v3255_v10  ;;  %v2757_v9 = vld [vmem:[#allocation3 + $0x178] sm:$0xff]  ;;  %v2760_v10 = vld [vmem:[#allocation3 + $0x160] sm:$0xff] }
 0x345   :  { %1115 = vmatpush1.msra.mxu0 %v3256_v11  ;;  %1186 = vmatpush1.msra.mxu1 %v3257_v12  ;;  %v2763_v11 = vld [vmem:[#allocation3 + $0x170] sm:$0xff]  ;;  %v2766_v12 = vld [vmem:[#allocation3 + $0x148] sm:$0xff] }
 0x346   :  { %1116 = vmatprep.subr.mxu0 %v3258_v13  ;;  %1187 = vmatprep.subr.mxu1 %v3259_v15  ;;  %v2769_v13 = vld [vmem:[#allocation3 + $0x158] sm:$0xff]  ;;  %v2772_v15 = vld [vmem:[#allocation3 + $0x140] sm:$0xff] }
 0x347   :  { %1117 = vmatpush1.msra.mxu0 %v3260_v16  ;;  %1188 = vmatpush1.msra.mxu1 %v3261_v17  ;;  %v2775_v16 = vld [vmem:[#allocation3 + $0x150] sm:$0xff]  ;;  %v2778_v17 = vld [vmem:[#allocation3 + $0x128] sm:$0xff] }
 0x348   :  { %1118 = vmatprep.subr.mxu0 %v3262_v18  ;;  %1189 = vmatprep.subr.mxu1 %v3263_v19  ;;  %v2781_v18 = vld [vmem:[#allocation3 + $0x138] sm:$0xff]  ;;  %v2784_v19 = vld [vmem:[#allocation3 + $0x120] sm:$0xff] }
 0x349   :  { %1119 = vmatpush1.msra.mxu0 %v3264_v20  ;;  %1190 = vmatpush1.msra.mxu1 %v3265_v21  ;;  %v2787_v20 = vld [vmem:[#allocation3 + $0x130] sm:$0xff]  ;;  %v2790_v21 = vld [vmem:[#allocation3 + $0x108] sm:$0xff] }
 0x34a   :  { %1120 = vmatprep.subr.mxu0 %v3266_v22  ;;  %1191 = vmatprep.subr.mxu1 %v3267_v24  ;;  %v2793_v22 = vld [vmem:[#allocation3 + $0x118] sm:$0xff]  ;;  %v2796_v24 = vld [vmem:[#allocation3 + $0x100] sm:$0xff] }
 0x34b   :  { %1121 = vmatpush1.msra.mxu0 %v3268_v25  ;;  %1154 = vmatprep.mubr.f32.mxu0 %v3269_v26  ;;  %v2799_v25 = vld [vmem:[#allocation3 + $0x110] sm:$0xff] }
 0x34c   :  { %1192 = vmatpush1.msra.mxu1 %v3270_v27  ;;  %1225 = vmatprep.mubr.f32.mxu1 %v3269_v26  ;;  %v2802_v27 = vld [vmem:[#allocation3 + $0xe8] sm:$0xff] }
 0x34d   :  { %1264 = vmatprep.subr.mxu0 %v2698_v28  ;;  %1335 = vmatprep.subr.mxu1 %v2701_v29 }
 0x3ec   :  { %v982_v30 = vpop.f32.mrf.mxu0  ;;  %v1053_v39 = vpop.f32.mrf.mxu1 }
 0x3ed   :  { %v1058_v33 = vadd.f32 %v982_v30, %v3273_v31  ;;  %v1060_v42 = vadd.f32 %v1053_v39, %v3275_v40  ;;  %v2805_v30 = vld [vmem:[#allocation3 + $0xf8] sm:$0xff]  ;;  %v2808_v31 = vld [vmem:[#allocation3 + $0xe0] sm:$0xff] }
 0x3ee   :  { %v984_v34 = vpop.f32.mrf.mxu0  ;;  %v1055_v43 = vpop.f32.mrf.mxu1  ;;  %v2829_v39 = vld [vmem:[#allocation3 + $0xb8] sm:$0xff]  ;;  %v2832_v40 = vld [vmem:[#allocation3 + $0xa0] sm:$0xff] }
 0x3ef   :  { %v1828_v35 = vmul.f32 -1.442695, %v1058_v33  ;;  %v1059_v37 = vadd.f32 %v984_v34, %v3274_v36  ;;  %v1830_v44 = vmul.f32 -1.442695, %v1060_v42  ;;  %v1061_v47 = vadd.f32 %v1055_v43, %v3276_v46  ;;  %v2811_v33 = vld [vmem:[#allocation3 + $0xf0] sm:$0xff]  ;;  %v2814_v34 = vld [vmem:[#allocation3 + $0xc8] sm:$0xff] }
 0x3f0   :  { %v2820_v36 = vld [vmem:[#allocation3 + $0xc0] sm:$0xff]  ;;  %v2835_v42 = vld [vmem:[#allocation3 + $0xb0] sm:$0xff]  ;;  %v2838_v43 = vld [vmem:[#allocation3 + $0x88] sm:$0xff] }
 0x3f1   :  { %1897 = vpow2.f32 %v1828_v35  ;;  %v1829_v38 = vmul.f32 -1.442695, %v1059_v37  ;;  %v2817_v35 = vld [vmem:[#allocation3 + $0xd8] sm:$0xff]  ;;  %v2823_v37 = vld [vmem:[#allocation3 + $0xd0] sm:$0xff] }
 0x3f2   :  { %v2847_v46 = vld [vmem:[#allocation3 + $0x90] sm:$0xff] }
 0x3f3   :  { %1899 = vpow2.f32 %v1829_v38  ;;  %v2826_v38 = vld [vmem:[#allocation3 + $0xa8] sm:$0xff]  ;;  %3277 = vst [vmem:[#allocation28_spill] sm:$0xff] %v2847_v46 }
 0x3f4   :  { %1901 = vpow2.f32 %v1830_v44  ;;  %v2841_v44 = vld [vmem:[#allocation3 + $0x98] sm:$0xff] }
 0x3fe   :  { %v1898_v45 = vpop.eup %1897 }
 0x3ff   :  { %v1071_v48 = vadd.f32 1.0, %v1898_v45  ;;  %v2844_v45 = vld [vmem:[#allocation3 + $0x80] sm:$0xff] }
 0x400   :  { %v1900_v49 = vpop.eup %1899 }
 0x401   :  { %1903 = vrcp.f32 %v1071_v48  ;;  %v1072_v51 = vadd.f32 1.0, %v1900_v49  ;;  %v1902_v52 = vpop.eup %1901  ;;  %v2853_v48 = vld [vmem:[#allocation3 + $0x78] sm:$0xff]  ;;  %v2856_v49 = vld [vmem:[#allocation3 + $0x60] sm:$0xff] }
 0x402   :  { %1905 = vtanh.f32 %v1061_v47  ;;  %v1073_v57 = vadd.f32 1.0, %v1902_v52  ;;  %v2850_v47 = vld [vmem:[#allocation3 + $0x68] sm:$0xff]  ;;  %3279 = vst [vmem:[#allocation29_spill] sm:$0xff] %v2853_v48  ;;  %3280 = vst [vmem:[#allocation6_spill] sm:$0xff] %v2856_v49 }
 0x403   :  { %1907 = vrcp.f32 %v1072_v51  ;;  %3278 = vst [vmem:[#allocation27_spill] sm:$0xff] %v2850_v47  ;;  %v2859_v51 = vld [vmem:[#allocation3 + $0x70] sm:$0xff]  ;;  %v2862_v52 = vld [vmem:[#allocation3 + $0x48] sm:$0xff] }
 0x404   :  { %1909 = vrcp.f32 %v1073_v57  ;;  %3281 = vst [vmem:[#allocation7_spill] sm:$0xff] %v2859_v51  ;;  %3282 = vst [vmem:[#allocation30_spill] sm:$0xff] %v2862_v52  ;;  %v2874_v57 = vld [vmem:[#allocation3 + $0x28] sm:$0xff] }
 0x405   :  { %3286 = vst [vmem:[#allocation9_spill] sm:$0xff] %v2874_v57 }
 0x40e   :  { %v1904_v53 = vpop.eup %1903 }
 0x40f   :  { %v1906_v54 = vpop.eup %1905 }
 0x410   :  { %v1908_v56 = vpop.eup %1907  ;;  %v1082_v55 = vmul.f32 %v1906_v54, %v1904_v53  ;;  %v2865_v53 = vld [vmem:[#allocation3 + $0x58] sm:$0xff]  ;;  %v2868_v54 = vld [vmem:[#allocation3 + $0x40] sm:$0xff] }
 0x411   :  { %v1081_v0 = vmul.f32 %v1908_v56, %v2631_v41  ;;  %v1910_v7 = vpop.eup %1909  ;;  %v2742_v41 = vld [vmem:[#allocation3 + $0x188] sm:$0xff]  ;;  %3283 = vst [vmem:[#allocation32_spill] sm:$0xff] %v2865_v53  ;;  %3284 = vst [vmem:[#allocation31_spill] sm:$0xff] %v2868_v54  ;;  %v2871_v56 = vld [vmem:[#allocation3 + $0x50] sm:$0xff] }
 0x412   :  { %3285 = vst [vmem:[#allocation33_spill] sm:$0xff] %v2871_v56 }
 0x413   :  { %v2709_v5 = vadd.f32 %v1082_v55, %v1081_v0  ;;  %v2877_v0 = vld [vmem:[#allocation3 + $0x38] sm:$0xff]  ;;  %v2880_v55 = vld [vmem:[#allocation3 + $0x20] sm:$0xff] }
 0x414   :  { %3287 = vst [vmem:[#allocation10_spill] sm:$0xff] %v2877_v0  ;;  %3288 = vst [vmem:[#allocation11_spill] sm:$0xff] %v2880_v55 }
 0x415   :  { %1911 = vtanh.f32 %v2709_v5 }
 0x422   :  { %v1912_v1 = vpop.eup %1911 }
 0x423   :  { %v1085_v4 = vmul.f32 %v1912_v1, %v1910_v7  ;;  %v2883_v7 = vld [vmem:[#allocation3 + $0x30] sm:$0xff]  ;;  %v2886_v1 = vld [vmem:[#allocation3 + $0x8] sm:$0xff] }
 0x424   :  { %3289 = vst [vmem:[#allocation12_spill] sm:$0xff] %v2883_v7  ;;  %3290 = vst [vmem:[#allocation13_spill] sm:$0xff] %v2886_v1 }
 0x425   :  { %1155 = vmatmul.mubr.f32.vlgmr.msra.gmra.mxu0 %v1085_v4  ;;  %1226 = vmatmul.mubr.f32.vlgmr.msra.gmra.mxu1 %v1085_v4  ;;  %v2889_v4 = vld [vmem:[#allocation3 + $0x18] sm:$0xff] }
 0x426   :  { %1265 = vmatpush1.msra.mxu0 %v2712_v3  ;;  %1336 = vmatpush1.msra.mxu1 %v2715_v6  ;;  %3291 = vst [vmem:[#allocation14_spill] sm:$0xff] %v2889_v4 }
 0x427   :  { %1266 = vmatprep.subr.mxu0 %v2718_v59  ;;  %1337 = vmatprep.subr.mxu1 %v2721_v23 }
 0x428   :  { %1267 = vmatpush1.msra.mxu0 %v2724_v50  ;;  %1338 = vmatpush1.msra.mxu1 %v2727_v61 }
 0x429   :  { %1268 = vmatprep.subr.mxu0 %v2730_v60  ;;  %1339 = vmatprep.subr.mxu1 %v2733_v62 }
 0x42a   :  { %1269 = vmatpush1.msra.mxu0 %v2736_v2  ;;  %1340 = vmatpush1.msra.mxu1 %v2739_v14 }
 0x42b   :  { %1270 = vmatprep.subr.mxu0 %v2742_v41  ;;  %1341 = vmatprep.subr.mxu1 %v2745_v58 }
 0x42c   :  { %1271 = vmatpush1.msra.mxu0 %v2748_v63  ;;  %1342 = vmatpush1.msra.mxu1 %v2751_v32 }
 0x42d   :  { %1272 = vmatprep.subr.mxu0 %v2754_v8  ;;  %1343 = vmatprep.subr.mxu1 %v2757_v9 }
 0x42e   :  { %1273 = vmatpush1.msra.mxu0 %v2760_v10  ;;  %1344 = vmatpush1.msra.mxu1 %v2763_v11 }
 0x42f   :  { %1274 = vmatprep.subr.mxu0 %v2766_v12  ;;  %1345 = vmatprep.subr.mxu1 %v2769_v13 }
 0x430   :  { %1275 = vmatpush1.msra.mxu0 %v2772_v15  ;;  %1346 = vmatpush1.msra.mxu1 %v2775_v16 }
 0x431   :  { %1276 = vmatprep.subr.mxu0 %v2778_v17  ;;  %1347 = vmatprep.subr.mxu1 %v2781_v18 }
 0x432   :  { %1277 = vmatpush1.msra.mxu0 %v2784_v19  ;;  %1348 = vmatpush1.msra.mxu1 %v2787_v20 }
 0x433   :  { %1278 = vmatprep.subr.mxu0 %v2790_v21  ;;  %1349 = vmatprep.subr.mxu1 %v2793_v22 }
 0x434   :  { %1279 = vmatpush1.msra.mxu0 %v2796_v24  ;;  %1350 = vmatpush1.msra.mxu1 %v2799_v25 }
 0x435   :  { %1280 = vmatprep.subr.mxu0 %v2802_v27  ;;  %1351 = vmatprep.subr.mxu1 %v2805_v30 }
 0x436   :  { %1281 = vmatpush1.msra.mxu0 %v2808_v31  ;;  %1352 = vmatpush1.msra.mxu1 %v2811_v33 }
 0x437   :  { %1282 = vmatprep.subr.mxu0 %v2814_v34  ;;  %1353 = vmatprep.subr.mxu1 %v2817_v35 }
 0x438   :  { %1283 = vmatpush1.msra.mxu0 %v2820_v36  ;;  %1354 = vmatpush1.msra.mxu1 %v2823_v37 }
 0x439   :  { %1284 = vmatprep.subr.mxu0 %v2826_v38  ;;  %1355 = vmatprep.subr.mxu1 %v2829_v39 }
 0x43a   :  { %1285 = vmatpush1.msra.mxu0 %v2832_v40  ;;  %1356 = vmatpush1.msra.mxu1 %v2835_v42 }
 0x43b   :  { %1286 = vmatprep.subr.mxu0 %v2838_v43  ;;  %1357 = vmatprep.subr.mxu1 %v2841_v44 }
 0x43c   :  { %1287 = vmatpush1.msra.mxu0 %v2844_v45  ;;  %1358 = vmatpush1.msra.mxu1 %v2847_v46 }
 0x43d   :  { %1288 = vmatprep.subr.mxu0 %v2850_v47  ;;  %1359 = vmatprep.subr.mxu1 %v2853_v48  ;;  %v3297_v47 = vld [vmem:[#allocation41_spill] sm:$0xff] }
 0x43e   :  { %1289 = vmatpush1.msra.mxu0 %v2856_v49  ;;  %1360 = vmatpush1.msra.mxu1 %v2859_v51  ;;  %v3296_v51 = vld [vmem:[#allocation39_spill] sm:$0xff] }
 0x43f   :  { %1290 = vmatprep.subr.mxu0 %v2862_v52  ;;  %1361 = vmatprep.subr.mxu1 %v2865_v53 }
 0x440   :  { %1291 = vmatpush1.msra.mxu0 %v2868_v54  ;;  %1362 = vmatpush1.msra.mxu1 %v2871_v56  ;;  %v3295_v54 = vld [vmem:[#allocation40_spill] sm:$0xff] }
 0x441   :  { %1292 = vmatprep.subr.mxu0 %v2874_v57  ;;  %1363 = vmatprep.subr.mxu1 %v2877_v0  ;;  %v2892_v57 = vld [vmem:[#allocation3] sm:$0xff]  ;;  %v2896_v0 = vld [vmem:[#allocation3 + $0x10] sm:$0xff] }
 0x442   :  { %1293 = vmatpush1.msra.mxu0 %v2880_v55  ;;  %1364 = vmatpush1.msra.mxu1 %v2883_v7  ;;  %3292 = vst [vmem:[#allocation15_spill] sm:$0xff] %v2892_v57  ;;  %3293 = vst [vmem:[#allocation16_spill] sm:$0xff] %v2896_v0  ;;  %v3294_v7 = vld [vmem:[#allocation38_spill] sm:$0xff] }
 0x443   :  { %1294 = vmatprep.subr.mxu0 %v2886_v1  ;;  %1365 = vmatprep.subr.mxu1 %v2889_v4 }
 0x444   :  { %1295 = vmatpush1.msra.mxu0 %v2892_v57  ;;  %1328 = vmatprep.mubr.f32.mxu0 %v3269_v26 }
 0x445   :  { %1366 = vmatpush1.msra.mxu1 %v2896_v0  ;;  %1399 = vmatprep.mubr.f32.mxu1 %v3269_v26 }
 0x446   :  { %1438 = vmatprep.subr.mxu0 %v2698_v28  ;;  %1509 = vmatprep.subr.mxu1 %v2701_v29 }
 0x4e5   :  { %v1156_v1 = vpop.f32.mrf.mxu0  ;;  %v1227_v52 = vpop.f32.mrf.mxu1 }
 0x4e6   :  { %v1232_v55 = vadd.f32 %v1156_v1, %v3294_v7  ;;  %v1234_v49 = vadd.f32 %v1227_v52, %v3296_v51 }
 0x4e7   :  { %v1158_v4 = vpop.f32.mrf.mxu0  ;;  %v1229_v0 = vpop.f32.mrf.mxu1 }
 0x4e8   :  { %v1831_v56 = vmul.f32 -1.442695, %v1232_v55  ;;  %v1233_v53 = vadd.f32 %v1158_v4, %v3295_v54  ;;  %v1833_v48 = vmul.f32 -1.442695, %v1234_v49  ;;  %v1235_v28 = vadd.f32 %v1229_v0, %v3297_v47  ;;  %v3302_v49 = vld [vmem:[#allocation7_spill] sm:$0xff]  ;;  %v3303_v0 = vld [vmem:[#allocation30_spill] sm:$0xff] }
 0x4e9   :  { %v3304_v4 = vld [vmem:[#allocation32_spill] sm:$0xff] }
 0x4ea   :  { %1913 = vpow2.f32 %v1831_v56  ;;  %v1832_v57 = vmul.f32 -1.442695, %v1233_v53 }
 0x4ec   :  { %1915 = vpow2.f32 %v1832_v57 }
 0x4ed   :  { %1917 = vpow2.f32 %v1833_v48 }
 0x4f7   :  { %v1914_v26 = vpop.eup %1913 }
 0x4f8   :  { %v1245_v46 = vadd.f32 1.0, %v1914_v26 }
 0x4f9   :  { %v1916_v29 = vpop.eup %1915 }
 0x4fa   :  { %1919 = vrcp.f32 %v1245_v46  ;;  %v1246_v7 = vadd.f32 1.0, %v1916_v29  ;;  %v1918_v55 = vpop.eup %1917  ;;  %v3299_v29 = vld [vmem:[#allocation27_spill] sm:$0xff]  ;;  %v3301_v46 = vld [vmem:[#allocation6_spill] sm:$0xff] }
 0x4fb   :  { %1921 = vtanh.f32 %v1235_v28  ;;  %v1247_v57 = vadd.f32 1.0, %v1918_v55  ;;  %v3298_v28 = vld [vmem:[#allocation28_spill] sm:$0xff]  ;;  %v3306_v55 = vld [vmem:[#allocation33_spill] sm:$0xff] }
 0x4fc   :  { %1923 = vrcp.f32 %v1246_v7  ;;  %v3305_v7 = vld [vmem:[#allocation31_spill] sm:$0xff] }
 0x4fd   :  { %1925 = vrcp.f32 %v1247_v57  ;;  %v3310_v57 = vld [vmem:[#allocation12_spill] sm:$0xff] }
 0x507   :  { %v1920_v54 = vpop.eup %1919 }
 0x508   :  { %v1922_v56 = vpop.eup %1921 }
 0x509   :  { %v1924_v53 = vpop.eup %1923  ;;  %v1256_v51 = vmul.f32 %v1922_v56, %v1920_v54  ;;  %v3307_v54 = vld [vmem:[#allocation9_spill] sm:$0xff]  ;;  %v3308_v56 = vld [vmem:[#allocation10_spill] sm:$0xff] }
 0x50a   :  { %v1255_v1 = vmul.f32 %v1924_v53, %v2709_v5  ;;  %v1926_v26 = vpop.eup %1925  ;;  %v3300_v5 = vld [vmem:[#allocation29_spill] sm:$0xff]  ;;  %v3309_v53 = vld [vmem:[#allocation11_spill] sm:$0xff] }
 0x50c   :  { %v2907_v52 = vadd.f32 %v1256_v51, %v1255_v1  ;;  %v3311_v1 = vld [vmem:[#allocation13_spill] sm:$0xff]  ;;  %v3312_v51 = vld [vmem:[#allocation14_spill] sm:$0xff] }
 0x50e   :  { %1927 = vtanh.f32 %v2907_v52 }
 0x51b   :  { %v1928_v47 = vpop.eup %1927 }
 0x51c   :  { %v1259_v48 = vmul.f32 %v1928_v47, %v1926_v26  ;;  %v3313_v26 = vld [vmem:[#allocation15_spill] sm:$0xff]  ;;  %v3314_v47 = vmov 0.0  }
 0x51e   :  { %1329 = vmatmul.mubr.f32.vlgmr.msra.gmra.mxu0 %v1259_v48  ;;  %1400 = vmatmul.mubr.f32.vlgmr.msra.gmra.mxu1 %v1259_v48  ;;  %v3315_v48 = vld [vmem:[#allocation16_spill] sm:$0xff] }
 0x51f   :  { %1439 = vmatpush1.msra.mxu0 %v2712_v3  ;;  %1510 = vmatpush1.msra.mxu1 %v2715_v6 }
 0x520   :  { %1440 = vmatprep.subr.mxu0 %v2718_v59  ;;  %1511 = vmatprep.subr.mxu1 %v2721_v23 }
 0x521   :  { %1441 = vmatpush1.msra.mxu0 %v2724_v50  ;;  %1512 = vmatpush1.msra.mxu1 %v2727_v61 }
 0x522   :  { %1442 = vmatprep.subr.mxu0 %v2730_v60  ;;  %1513 = vmatprep.subr.mxu1 %v2733_v62 }
 0x523   :  { %1443 = vmatpush1.msra.mxu0 %v2736_v2  ;;  %1514 = vmatpush1.msra.mxu1 %v2739_v14 }
 0x524   :  { %1444 = vmatprep.subr.mxu0 %v2742_v41  ;;  %1515 = vmatprep.subr.mxu1 %v2745_v58 }
 0x525   :  { %1445 = vmatpush1.msra.mxu0 %v2748_v63  ;;  %1516 = vmatpush1.msra.mxu1 %v2751_v32 }
 0x526   :  { %1446 = vmatprep.subr.mxu0 %v2754_v8  ;;  %1517 = vmatprep.subr.mxu1 %v2757_v9 }
 0x527   :  { %1447 = vmatpush1.msra.mxu0 %v2760_v10  ;;  %1518 = vmatpush1.msra.mxu1 %v2763_v11 }
 0x528   :  { %1448 = vmatprep.subr.mxu0 %v2766_v12  ;;  %1519 = vmatprep.subr.mxu1 %v2769_v13 }
 0x529   :  { %1449 = vmatpush1.msra.mxu0 %v2772_v15  ;;  %1520 = vmatpush1.msra.mxu1 %v2775_v16 }
 0x52a   :  { %1450 = vmatprep.subr.mxu0 %v2778_v17  ;;  %1521 = vmatprep.subr.mxu1 %v2781_v18 }
 0x52b   :  { %1451 = vmatpush1.msra.mxu0 %v2784_v19  ;;  %1522 = vmatpush1.msra.mxu1 %v2787_v20 }
 0x52c   :  { %1452 = vmatprep.subr.mxu0 %v2790_v21  ;;  %1523 = vmatprep.subr.mxu1 %v2793_v22 }
 0x52d   :  { %1453 = vmatpush1.msra.mxu0 %v2796_v24  ;;  %1524 = vmatpush1.msra.mxu1 %v2799_v25 }
 0x52e   :  { %1454 = vmatprep.subr.mxu0 %v2802_v27  ;;  %1525 = vmatprep.subr.mxu1 %v2805_v30 }
 0x52f   :  { %1455 = vmatpush1.msra.mxu0 %v2808_v31  ;;  %1526 = vmatpush1.msra.mxu1 %v2811_v33 }
 0x530   :  { %1456 = vmatprep.subr.mxu0 %v2814_v34  ;;  %1527 = vmatprep.subr.mxu1 %v2817_v35 }
 0x531   :  { %1457 = vmatpush1.msra.mxu0 %v2820_v36  ;;  %1528 = vmatpush1.msra.mxu1 %v2823_v37 }
 0x532   :  { %1458 = vmatprep.subr.mxu0 %v2826_v38  ;;  %1529 = vmatprep.subr.mxu1 %v2829_v39 }
 0x533   :  { %1459 = vmatpush1.msra.mxu0 %v2832_v40  ;;  %1530 = vmatpush1.msra.mxu1 %v2835_v42 }
 0x534   :  { %1460 = vmatprep.subr.mxu0 %v2838_v43  ;;  %1531 = vmatprep.subr.mxu1 %v2841_v44 }
 0x535   :  { %1461 = vmatpush1.msra.mxu0 %v2844_v45  ;;  %1532 = vmatpush1.msra.mxu1 %v3298_v28 }
 0x536   :  { %1462 = vmatprep.subr.mxu0 %v3299_v29  ;;  %1533 = vmatprep.subr.mxu1 %v3300_v5  ;;  %v3321_v29 = vld [vmem:[#allocation46_spill] sm:$0xff] }
 0x537   :  { %1463 = vmatpush1.msra.mxu0 %v3301_v46  ;;  %1534 = vmatpush1.msra.mxu1 %v3302_v49  ;;  %v3320_v49 = vld [vmem:[#allocation44_spill] sm:$0xff] }
 0x538   :  { %1464 = vmatprep.subr.mxu0 %v3303_v0  ;;  %1535 = vmatprep.subr.mxu1 %v3304_v4 }
 0x539   :  { %1465 = vmatpush1.msra.mxu0 %v3305_v7  ;;  %1536 = vmatpush1.msra.mxu1 %v3306_v55  ;;  %v3316_v55 = vld [vmem:[#allocation8_spill] sm:$0xff] }
 0x53a   :  { %1466 = vmatprep.subr.mxu0 %v3307_v54  ;;  %1537 = vmatprep.subr.mxu1 %v3308_v56  ;;  %v3317_v54 = vld [vmem:[#allocation26_spill] sm:$0xff] }
 0x53b   :  { %1467 = vmatpush1.msra.mxu0 %v3309_v53  ;;  %1538 = vmatpush1.msra.mxu1 %v3310_v57  ;;  %v3318_v53 = vld [vmem:[#allocation42_spill] sm:$0xff] }
 0x53c   :  { %1468 = vmatprep.subr.mxu0 %v3311_v1  ;;  %1539 = vmatprep.subr.mxu1 %v3312_v51  ;;  %v3319_v1 = vld [vmem:[#allocation43_spill] sm:$0xff] }
 0x53d   :  { %1469 = vmatpush1.msra.mxu0 %v3313_v26  ;;  %1502 = vmatprep.mubr.f32.mxu0 %v3314_v47 }
 0x53e   :  { %1540 = vmatpush1.msra.mxu1 %v3315_v48  ;;  %1573 = vmatprep.mubr.f32.mxu1 %v3314_v47 }
 0x53f   :  { %1612 = vmatprep.subr.mxu0 %v3316_v55  ;;  %1683 = vmatprep.subr.mxu1 %v3317_v54 }
 0x5de   :  { %v1330_v56 = vpop.f32.mrf.mxu0  ;;  %v1401_v26 = vpop.f32.mrf.mxu1 }
 0x5df   :  { %v1406_v7 = vadd.f32 %v1330_v56, %v3318_v53  ;;  %v1408_v46 = vadd.f32 %v1401_v26, %v3320_v49 }
 0x5e0   :  { %v1332_v57 = vpop.f32.mrf.mxu0  ;;  %v1403_v48 = vpop.f32.mrf.mxu1 }
 0x5e1   :  { %v1834_v4 = vmul.f32 -1.442695, %v1406_v7  ;;  %v1407_v0 = vadd.f32 %v1332_v57, %v3319_v1  ;;  %v1836_v5 = vmul.f32 -1.442695, %v1408_v46  ;;  %v1409_v55 = vadd.f32 %v1403_v48, %v3321_v29  ;;  %v3344_v48 = vld [vmem:[#allocation49_spill] sm:$0xff] }
 0x5e3   :  { %1929 = vpow2.f32 %v1834_v4  ;;  %v1835_v51 = vmul.f32 -1.442695, %v1407_v0 }
 0x5e5   :  { %1931 = vpow2.f32 %v1835_v51 }
 0x5e6   :  { %1933 = vpow2.f32 %v1836_v5 }
 0x5f0   :  { %v1930_v47 = vpop.eup %1929 }
 0x5f1   :  { %v1419_v28 = vadd.f32 1.0, %v1930_v47 }
 0x5f2   :  { %v1932_v54 = vpop.eup %1931 }
 0x5f3   :  { %1935 = vrcp.f32 %v1419_v28  ;;  %v1420_v56 = vadd.f32 1.0, %v1932_v54  ;;  %v1934_v7 = vpop.eup %1933 }
 0x5f4   :  { %1937 = vtanh.f32 %v1409_v55  ;;  %v1421_v57 = vadd.f32 1.0, %v1934_v7  ;;  %v3345_v7 = vld [vmem:[#allocation50_spill] sm:$0xff] }
 0x5f5   :  { %1939 = vrcp.f32 %v1420_v56 }
 0x5f6   :  { %1941 = vrcp.f32 %v1421_v57  ;;  %v3346_v57 = vld [vmem:[#allocation52_spill] sm:$0xff] }
 0x600   :  { %v1936_v53 = vpop.eup %1935 }
 0x601   :  { %v1938_v4 = vpop.eup %1937 }
 0x602   :  { %v1940_v0 = vpop.eup %1939  ;;  %v1430_v49 = vmul.f32 %v1938_v4, %v1936_v53 }
 0x603   :  { %v1429_v1 = vmul.f32 %v1940_v0, %v2907_v52  ;;  %v1942_v29 = vpop.eup %1941 }
 0x605   :  { %v2981_v51 = vadd.f32 %v1430_v49, %v1429_v1 }
 0x607   :  { %1943 = vtanh.f32 %v2981_v51 }
 0x614   :  { %v1944_v46 = vpop.eup %1943 }
 0x615   :  { %v1433_v5 = vmul.f32 %v1944_v46, %v1942_v29  ;;  %v3347_v46 = vld [vmem:[#allocation53_spill] sm:$0xff] }
 0x617   :  { %1503 = vmatmul.mubr.f32.vlgmr.msra.gmra.mxu0 %v1433_v5  ;;  %1574 = vmatmul.mubr.f32.vlgmr.msra.gmra.mxu1 %v1433_v5 }
 0x618   :  { %1613 = vmatpush1.msra.mxu0 %v2712_v3  ;;  %1684 = vmatpush1.msra.mxu1 %v2715_v6  ;;  %v3322_v3 = vld [vmem:[#allocation28_spill] sm:$0xff]  ;;  %v3323_v6 = vld [vmem:[#allocation27_spill] sm:$0xff] }
 0x619   :  { %1614 = vmatprep.subr.mxu0 %v2718_v59  ;;  %1685 = vmatprep.subr.mxu1 %v2721_v23  ;;  %v3324_v59 = vld [vmem:[#allocation29_spill] sm:$0xff]  ;;  %v3325_v23 = vld [vmem:[#allocation6_spill] sm:$0xff] }
 0x61a   :  { %1615 = vmatpush1.msra.mxu0 %v2724_v50  ;;  %1686 = vmatpush1.msra.mxu1 %v2727_v61  ;;  %v3326_v50 = vld [vmem:[#allocation7_spill] sm:$0xff]  ;;  %v3327_v61 = vld [vmem:[#allocation30_spill] sm:$0xff] }
 0x61b   :  { %1616 = vmatprep.subr.mxu0 %v2730_v60  ;;  %1687 = vmatprep.subr.mxu1 %v2733_v62  ;;  %v3328_v60 = vld [vmem:[#allocation32_spill] sm:$0xff]  ;;  %v3329_v62 = vld [vmem:[#allocation31_spill] sm:$0xff] }
 0x61c   :  { %1617 = vmatpush1.msra.mxu0 %v2736_v2  ;;  %1688 = vmatpush1.msra.mxu1 %v2739_v14  ;;  %v3330_v2 = vld [vmem:[#allocation33_spill] sm:$0xff] }
 0x61d   :  { %1618 = vmatprep.subr.mxu0 %v2742_v41  ;;  %1689 = vmatprep.subr.mxu1 %v2745_v58  ;;  %v3331_v14 = vld [vmem:[#allocation9_spill] sm:$0xff]  ;;  %v3332_v41 = vld [vmem:[#allocation10_spill] sm:$0xff]  ;;  %v3333_v58 = vld [vmem:[#allocation11_spill] sm:$0xff] }
 0x61e   :  { %1619 = vmatpush1.msra.mxu0 %v2748_v63  ;;  %1690 = vmatpush1.msra.mxu1 %v2751_v32  ;;  %v3334_v63 = vld [vmem:[#allocation12_spill] sm:$0xff]  ;;  %v3335_v32 = vld [vmem:[#allocation13_spill] sm:$0xff] }
 0x61f   :  { %1620 = vmatprep.subr.mxu0 %v2754_v8  ;;  %1691 = vmatprep.subr.mxu1 %v2757_v9  ;;  %v3336_v8 = vld [vmem:[#allocation14_spill] sm:$0xff]  ;;  %v3337_v9 = vld [vmem:[#allocation15_spill] sm:$0xff] }
 0x620   :  { %1621 = vmatpush1.msra.mxu0 %v2760_v10  ;;  %1692 = vmatpush1.msra.mxu1 %v2763_v11  ;;  %v3338_v10 = vmov 0.0   ;;  %v3339_v11 = vld [vmem:[#allocation16_spill] sm:$0xff] }
 0x621   :  { %1622 = vmatprep.subr.mxu0 %v2766_v12  ;;  %1693 = vmatprep.subr.mxu1 %v2769_v13  ;;  %v3340_v13 = vld [vmem:[#allocation45_spill] sm:$0xff] }
 0x622   :  { %1623 = vmatpush1.msra.mxu0 %v2772_v15  ;;  %1694 = vmatpush1.msra.mxu1 %v2775_v16 }
 0x623   :  { %1624 = vmatprep.subr.mxu0 %v2778_v17  ;;  %1695 = vmatprep.subr.mxu1 %v2781_v18  ;;  %v3341_v18 = vld [vmem:[#allocation47_spill] sm:$0xff] }
 0x624   :  { %1625 = vmatpush1.msra.mxu0 %v2784_v19  ;;  %1696 = vmatpush1.msra.mxu1 %v2787_v20 }
 0x625   :  { %1626 = vmatprep.subr.mxu0 %v2790_v21  ;;  %1697 = vmatprep.subr.mxu1 %v2793_v22  ;;  %v3342_v22 = vld [vmem:[#allocation48_spill] sm:$0xff] }
 0x626   :  { %1627 = vmatpush1.msra.mxu0 %v2796_v24  ;;  %1698 = vmatpush1.msra.mxu1 %v2799_v25 }
 0x627   :  { %1628 = vmatprep.subr.mxu0 %v2802_v27  ;;  %1699 = vmatprep.subr.mxu1 %v2805_v30 }
 0x628   :  { %1629 = vmatpush1.msra.mxu0 %v2808_v31  ;;  %1700 = vmatpush1.msra.mxu1 %v2811_v33  ;;  %v3343_v31 = vld [vmem:[#allocation51_spill] sm:$0xff] }
 0x629   :  { %1630 = vmatprep.subr.mxu0 %v2814_v34  ;;  %1701 = vmatprep.subr.mxu1 %v2817_v35 }
 0x62a   :  { %1631 = vmatpush1.msra.mxu0 %v2820_v36  ;;  %1702 = vmatpush1.msra.mxu1 %v2823_v37 }
 0x62b   :  { %1632 = vmatprep.subr.mxu0 %v2826_v38  ;;  %1703 = vmatprep.subr.mxu1 %v2829_v39 }
 0x62c   :  { %1633 = vmatpush1.msra.mxu0 %v2832_v40  ;;  %1704 = vmatpush1.msra.mxu1 %v2835_v42 }
 0x62d   :  { %1634 = vmatprep.subr.mxu0 %v2838_v43  ;;  %1705 = vmatprep.subr.mxu1 %v2841_v44 }
 0x62e   :  { %1635 = vmatpush1.msra.mxu0 %v2844_v45  ;;  %1706 = vmatpush1.msra.mxu1 %v3322_v3 }
 0x62f   :  { %1636 = vmatprep.subr.mxu0 %v3323_v6  ;;  %1707 = vmatprep.subr.mxu1 %v3324_v59 }
 0x630   :  { %1637 = vmatpush1.msra.mxu0 %v3325_v23  ;;  %1708 = vmatpush1.msra.mxu1 %v3326_v50 }
 0x631   :  { %1638 = vmatprep.subr.mxu0 %v3327_v61  ;;  %1709 = vmatprep.subr.mxu1 %v3328_v60 }
 0x632   :  { %1639 = vmatpush1.msra.mxu0 %v3329_v62  ;;  %1710 = vmatpush1.msra.mxu1 %v3330_v2 }
 0x633   :  { %1640 = vmatprep.subr.mxu0 %v3331_v14  ;;  %1711 = vmatprep.subr.mxu1 %v3332_v41 }
 0x634   :  { %1641 = vmatpush1.msra.mxu0 %v3333_v58  ;;  %1712 = vmatpush1.msra.mxu1 %v3334_v63 }
 0x635   :  { %1642 = vmatprep.subr.mxu0 %v3335_v32  ;;  %1713 = vmatprep.subr.mxu1 %v3336_v8  ;;  %v1843_v32 = vld [vmem:[%s3069_s3] ss:$0 sm:$0xff] }
 0x636   :  { %1643 = vmatpush1.msra.mxu0 %v3337_v9  ;;  %1676 = vmatprep.mubr.f32.mxu0 %v3338_v10 }
 0x637   :  { %1714 = vmatpush1.msra.mxu1 %v3339_v11  ;;  %1747 = vmatprep.mubr.f32.mxu1 %v3338_v10  ;;  %v1844_v10 = vld [vmem:[%s3069_s3 + $0x1] ss:$0 sm:$0xff] }
 0x6d7   :  { %v1504_v12 = vpop.f32.mrf.mxu0  ;;  %v1575_v21 = vpop.f32.mrf.mxu1 }
 0x6d8   :  { %v1580_v15 = vadd.f32 %v1504_v12, %v3340_v13  ;;  %v1582_v24 = vadd.f32 %v1575_v21, %v3342_v22 }
 0x6d9   :  { %v1506_v16 = vpop.f32.mrf.mxu0  ;;  %v1577_v25 = vpop.f32.mrf.mxu1 }
 0x6da   :  { %v1837_v17 = vmul.f32 -1.442695, %v1580_v15  ;;  %v1581_v19 = vadd.f32 %v1506_v16, %v3341_v18  ;;  %v1839_v27 = vmul.f32 -1.442695, %v1582_v24  ;;  %v1583_v33 = vadd.f32 %v1577_v25, %v3343_v31 }
 0x6dc   :  { %1945 = vpow2.f32 %v1837_v17  ;;  %v1838_v20 = vmul.f32 -1.442695, %v1581_v19 }
 0x6de   :  { %1947 = vpow2.f32 %v1838_v20 }
 0x6df   :  { %1949 = vpow2.f32 %v1839_v27 }
 0x6e9   :  { %v1946_v30 = vpop.eup %1945 }
 0x6ea   :  { %v1593_v34 = vadd.f32 1.0, %v1946_v30 }
 0x6eb   :  { %v1948_v35 = vpop.eup %1947 }
 0x6ec   :  { %1951 = vrcp.f32 %v1593_v34  ;;  %v1594_v36 = vadd.f32 1.0, %v1948_v35  ;;  %v1950_v37 = vpop.eup %1949 }
 0x6ed   :  { %1953 = vtanh.f32 %v1583_v33  ;;  %v1595_v42 = vadd.f32 1.0, %v1950_v37 }
 0x6ee   :  { %1955 = vrcp.f32 %v1594_v36 }
 0x6ef   :  { %1957 = vrcp.f32 %v1595_v42 }
 0x6f9   :  { %v1952_v38 = vpop.eup %1951 }
 0x6fa   :  { %v1954_v39 = vpop.eup %1953 }
 0x6fb   :  { %v1956_v40 = vpop.eup %1955  ;;  %v1604_v44 = vmul.f32 %v1954_v39, %v1952_v38 }
 0x6fc   :  { %v1603_v43 = vmul.f32 %v1956_v40, %v2981_v51  ;;  %v1958_v52 = vpop.eup %1957 }
 0x6fe   :  { %v1605_v45 = vadd.f32 %v1604_v44, %v1603_v43 }
 0x700   :  { %1959 = vtanh.f32 %v1605_v45 }
 0x70d   :  { %v1960_v28 = vpop.eup %1959 }
 0x70e   :  { %v1607_v26 = vmul.f32 %v1960_v28, %v1958_v52 }
 0x710   :  { %1677 = vmatmul.mubr.f32.vlgmr.msra.gmra.mxu0 %v1607_v26  ;;  %1748 = vmatmul.mubr.f32.vlgmr.msra.gmra.mxu1 %v1607_v26 }
 0x7d0   :  { %v1678_v47 = vpop.f32.mrf.mxu0  ;;  %v1749_v0 = vpop.f32.mrf.mxu1 }
 0x7d1   :  { %v1754_v55 = vadd.f32 %v1678_v47, %v3344_v48  ;;  %v1756_v1 = vadd.f32 %v1749_v0, %v3346_v57 }
 0x7d2   :  { %v1680_v54 = vpop.f32.mrf.mxu0  ;;  %v1751_v49 = vpop.f32.mrf.mxu1 }
 0x7d3   :  { %v1840_v56 = vmul.f32 -1.442695, %v1754_v55  ;;  %v1755_v53 = vadd.f32 %v1680_v54, %v3345_v7  ;;  %v1842_v51 = vmul.f32 -1.442695, %v1756_v1  ;;  %v1757_v5 = vadd.f32 %v1751_v49, %v3347_v46 }
 0x7d5   :  { %1961 = vpow2.f32 %v1840_v56  ;;  %v1841_v4 = vmul.f32 -1.442695, %v1755_v53 }
 0x7d7   :  { %1963 = vpow2.f32 %v1841_v4 }
 0x7d8   :  { %1965 = vpow2.f32 %v1842_v51 }
 0x7e2   :  { %v1962_v29 = vpop.eup %1961 }
 0x7e3   :  { %v1767_v3 = vadd.f32 1.0, %v1962_v29 }
 0x7e4   :  { %v1964_v6 = vpop.eup %1963 }
 0x7e5   :  { %1967 = vrcp.f32 %v1767_v3  ;;  %v1768_v59 = vadd.f32 1.0, %v1964_v6  ;;  %v1966_v23 = vpop.eup %1965 }
 0x7e6   :  { %1969 = vtanh.f32 %v1757_v5  ;;  %v1769_v62 = vadd.f32 1.0, %v1966_v23 }
 0x7e7   :  { %1971 = vrcp.f32 %v1768_v59 }
 0x7e8   :  { %1973 = vrcp.f32 %v1769_v62 }
 0x7f2   :  { %v1968_v50 = vpop.eup %1967 }
 0x7f3   :  { %v1970_v61 = vpop.eup %1969 }
 0x7f4   :  { %v1972_v60 = vpop.eup %1971  ;;  %v1778_v2 = vmul.f32 %v1970_v61, %v1968_v50 }
 0x7f5   :  { %v1777_v14 = vmul.f32 %v1972_v60, %v1605_v45  ;;  %v1974_v58 = vpop.eup %1973 }
 0x7f7   :  { %v1779_v41 = vadd.f32 %v1778_v2, %v1777_v14 }
 0x7f9   :  { %1975 = vtanh.f32 %v1779_v41 }
 0x806   :  { %v1976_v63 = vpop.eup %1975 }
 0x807   :  { %v1781_v8 = vmul.f32 %v1976_v63, %v1974_v58 }
 0x809   :  { %v1787_v9 = vmul.f32 %v1843_v32, %v1781_v8 }
 0x80b   :  { %1788 = vadd.xlane.f32.xlu0 %v1787_v9 }
 0x894   :  { %v1789_v11 = vpop.xlane.xlu0 %1788 }
 0x895   :  { %v1795_v12 = vadd.f32 %v1844_v10, %v1789_v11 }
 0x897   :  { %1797 = vst.msk [vmem:[%s3070_s4] sm:$0xff] %vm1796_vm1, %v1795_v12 }
 0x898   :  { %1802 = vsyncpa [#allocation4], 1 }

</bundles_post_ra>
